<compile_context>
chip_gen: v7x
topology: tpu7x:2x2x1
jax: 0.10.0
libtpu: 0.0.40
codegen_flags: <defaults>
</compile_context>

<pallas_src>
import jax
import jax.numpy as jnp
from jax.experimental import pallas as pl
from jax.experimental.pallas import tpu as pltpu


# --- small synthetic ViT config (consistent with the module's forward) -------
B, C, IMG, P = 2, 3, 16, 8
NUM_PATCHES = (IMG // P) ** 2          # 4
PATCH_DIM = C * P * P                  # 192
SEQ = NUM_PATCHES + 1                  # 5  (cls token + patches)
HID = 32                               # hidden size
NH = 4                                 # attention heads
HD = HID // NH                         # 8  head dim
FF = 64                                # MLP intermediate
LAYERS = 2
N_BIRADS, N_DENSITY = 5, 4
HEAD_PAD = 128                         # lane-dense classifier output slab
LN_EPS = 1e-12                         # HF ViT layer_norm_eps
ATTN_SCALE = 1.0 / (HD ** 0.5)
NEG_INF = -1e30

# --- packed weight slab layout (rows; everything padded to 128 lanes) --------
PW_OFF = 0                                   # patch_w  (PATCH_DIM x HID)
L_W_BASE = PATCH_DIM                         # 192
WQKV_OFF, WO_OFF, WI_OFF, WOUT_OFF = 0, HID, 2 * HID, 3 * HID
L_W_STRIDE = 3 * HID + FF                    # wqkv(32)+wo(32)+wi(32)+wout(64)=160
HEADW_OFF = L_W_BASE + LAYERS * L_W_STRIDE   # 512
W_ROWS = HEADW_OFF + HID                     # 544

# --- packed bias / LN-vector slab layout (rows) -------------------------------
PB_ROW, CLS_ROW, POS_ROW = 0, 1, 2           # pos_emb occupies SEQ rows
L_V_BASE = POS_ROW + SEQ                     # 7
# per layer: +0 ln1_g, +1 ln1_b, +2 bqkv, +3 bo, +4 ln2_g, +5 ln2_b, +6 bi, +7 bout
L_V_STRIDE = 8
FLN_G_ROW = L_V_BASE + LAYERS * L_V_STRIDE   # 23
FLN_B_ROW = FLN_G_ROW + 1                    # 24
HEADB_ROW = FLN_B_ROW + 1                    # 25
V_ROWS = HEADB_ROW + 1                       # 26


# ----------------------------------------------------------------------------
# Fused forward kernel (one grid step = one image)
# ----------------------------------------------------------------------------
def _layer_norm(x, g, b):
    mean = jnp.mean(x, axis=-1, keepdims=True)
    var = jnp.mean(jnp.square(x - mean), axis=-1, keepdims=True)
    return (x - mean) * jax.lax.rsqrt(var + LN_EPS) * g + b


def _vit_forward_kernel(patches_ref, w_ref, v_ref, out_ref):
    f32 = jnp.float32

    def vrow(r, width=HID):                      # (1, width) vector / bias row
        return v_ref[r:r + 1, 0:width]

    def wmat(r0, rows, cols):                    # (rows, cols) weight matrix
        return w_ref[r0:r0 + rows, 0:cols]

    # ---- patch embedding + cls token + positional embedding -----------------
    patches = patches_ref[0]                                         # (NP, PATCH_DIM)
    emb = jnp.dot(patches, wmat(PW_OFF, PATCH_DIM, HID),
                  preferred_element_type=f32) + vrow(PB_ROW)         # (NP, HID)
    cls_row = vrow(CLS_ROW) + vrow(POS_ROW)                          # (1, HID)
    pos_rest = v_ref[POS_ROW + 1: POS_ROW + SEQ, 0:HID]              # (NP, HID)
    x = jnp.concatenate([cls_row, emb + pos_rest], axis=0)           # (SEQ, HID)

    # ---- head-block-diagonal mask for sublane-packed attention (hoisted) ----
    ri = jax.lax.broadcasted_iota(jnp.int32, (NH * SEQ, NH * SEQ), 0)
    ci = jax.lax.broadcasted_iota(jnp.int32, (NH * SEQ, NH * SEQ), 1)
    same_head = None
    for hh in range(NH):
        blk = ((ri >= hh * SEQ) & (ri < (hh + 1) * SEQ)
               & (ci >= hh * SEQ) & (ci < (hh + 1) * SEQ))
        same_head = blk if same_head is None else (same_head | blk)

    # ---- encoder layers (static unroll; everything stays in vregs) ----------
    for l in range(LAYERS):
        wb = L_W_BASE + l * L_W_STRIDE
        vb = L_V_BASE + l * L_V_STRIDE

        # --- self-attention sublayer ---
        h = _layer_norm(x, vrow(vb + 0), vrow(vb + 1))
        qkv = (jnp.dot(h, wmat(wb + WQKV_OFF, HID, 3 * HID),
                       preferred_element_type=f32)
               + vrow(vb + 2, 3 * HID))                               # (SEQ, 3*HID)

        # pack the NH heads onto the sublane axis -> one softmax per layer
        q_p = jnp.concatenate(
            [qkv[:, i * HD:(i + 1) * HD] for i in range(NH)], axis=0)             # (NH*SEQ, HD)
        k_p = jnp.concatenate(
            [qkv[:, HID + i * HD: HID + (i + 1) * HD] for i in range(NH)], axis=0)
        v_p = jnp.concatenate(
            [qkv[:, 2 * HID + i * HD: 2 * HID + (i + 1) * HD] for i in range(NH)], axis=0)

        s = jax.lax.dot_general(q_p, k_p, (((1,), (1,)), ((), ())),
                                preferred_element_type=f32) * ATTN_SCALE          # (NH*SEQ, NH*SEQ)
        s = jnp.where(same_head, s, NEG_INF)
        m = jnp.max(s, axis=-1, keepdims=True)
        p = jnp.exp(s - m)
        p = p / jnp.sum(p, axis=-1, keepdims=True)     # exact (matches torch softmax)
        ctx = jnp.dot(p, v_p, preferred_element_type=f32)                         # (NH*SEQ, HD)

        # unpack heads back onto the lane axis, single fused output projection
        ctx_cat = jnp.concatenate(
            [ctx[i * SEQ:(i + 1) * SEQ, :] for i in range(NH)], axis=1)           # (SEQ, HID)
        attn = (jnp.dot(ctx_cat, wmat(wb + WO_OFF, HID, HID),
                        preferred_element_type=f32) + vrow(vb + 3))
        x = x + attn                                                               # residual

        # --- MLP sublayer ---
        h2 = _layer_norm(x, vrow(vb + 4), vrow(vb + 5))
        # TODO(synk): HF ViT default "gelu" is the exact erf form; the tanh
        # approximation is used here for robust Mosaic lowering.
        h2 = jax.nn.gelu(
            jnp.dot(h2, wmat(wb + WI_OFF, HID, FF),
                    preferred_element_type=f32) + vrow(vb + 6, FF),
            approximate=True)
        x = x + (jnp.dot(h2, wmat(wb + WOUT_OFF, FF, HID),
                         preferred_element_type=f32) + vrow(vb + 7))              # residual

    # ---- final LN + fused classifier heads, cls row only ---------------------
    cls_tok = x[0:1, :]                                                            # (1, HID)
    hf = _layer_norm(cls_tok, vrow(FLN_G_ROW), vrow(FLN_B_ROW))
    logits = (jnp.dot(hf, wmat(HEADW_OFF, HID, HEAD_PAD),
                      preferred_element_type=f32)
              + v_ref[HEADB_ROW:HEADB_ROW + 1, :])                                 # (1, 128)
    out_ref[...] = logits.reshape(1, 1, HEAD_PAD).astype(out_ref.dtype)


# ----------------------------------------------------------------------------
# Wrapper
# ----------------------------------------------------------------------------
def vit_classifier_forward(packed, x):
    """x: (B, C, IMG, IMG) NCHW.  Returns (birads_logits, density_logits)."""
    # im2col of the stride-P patch conv (pure layout glue, one XLA op).
    # TODO(synk): could be folded into the kernel with strided reads.
    gh = gw = IMG // P
    patches = (x.reshape(B, C, gh, P, gw, P)
                .transpose(0, 2, 4, 1, 3, 5)
                .reshape(B, NUM_PATCHES, PATCH_DIM))

    logits = pl.pallas_call(
        _vit_forward_kernel,
        out_shape=jax.ShapeDtypeStruct((B, 1, HEAD_PAD), jnp.float32),
        grid=(B,),
        in_specs=[
            pl.BlockSpec((1, NUM_PATCHES, PATCH_DIM), lambda b: (b, 0, 0)),
            pl.BlockSpec((W_ROWS, HEAD_PAD), lambda b: (0, 0)),   # resident weights
            pl.BlockSpec((V_ROWS, HEAD_PAD), lambda b: (0, 0)),   # resident vectors
        ],
        out_specs=pl.BlockSpec((1, 1, HEAD_PAD), lambda b: (b, 0, 0)),
        compiler_params=pltpu.CompilerParams(
            dimension_semantics=("parallel",)),
    )(patches, packed["w_slab"], packed["v_slab"])

    logits = logits[:, 0, :]
    birads_logits = logits[:, :N_BIRADS]
    density_logits = logits[:, N_BIRADS:N_BIRADS + N_DENSITY]
    return birads_logits, density_logits


# ----------------------------------------------------------------------------
# Params (natural layout) and one-time packing into the two slabs
# ----------------------------------------------------------------------------
def init_params(key):
    std = 0.02
    keys = iter(jax.random.split(key, 64))

    def w(shape):
        return (std * jax.random.normal(next(keys), shape)).astype(jnp.float32)

    def zeros(shape):
        return jnp.zeros(shape, jnp.float32)

    def ones(shape):
        return jnp.ones(shape, jnp.float32)

    def stack(fn, shape):
        return jnp.stack([fn(shape) for _ in range(LAYERS)])

    # birads|density heads fused into one zero-padded lane-dense (HID,128) slab
    head_w = jnp.zeros((HID, HEAD_PAD), jnp.float32)
    head_w = head_w.at[:, :N_BIRADS].set(w((HID, N_BIRADS)))
    head_w = head_w.at[:, N_BIRADS:N_BIRADS + N_DENSITY].set(w((HID, N_DENSITY)))

    return {
        "patch_w": w((PATCH_DIM, HID)),
        "patch_b": zeros((1, HID)),
        "cls_token": w((1, HID)),
        "pos_emb": w((SEQ, HID)),
        "ln1_g": stack(ones, (1, HID)),
        "ln1_b": stack(zeros, (1, HID)),
        "wqkv": stack(w, (HID, 3 * HID)),        # q|k|v fused along output dim
        "bqkv": stack(zeros, (1, 3 * HID)),
        "wo": stack(w, (HID, HID)),
        "bo": stack(zeros, (1, HID)),
        "ln2_g": stack(ones, (1, HID)),
        "ln2_b": stack(zeros, (1, HID)),
        "wi": stack(w, (HID, FF)),
        "bi": stack(zeros, (1, FF)),
        "wout": stack(w, (FF, HID)),
        "bout": stack(zeros, (1, HID)),
        "final_ln_g": ones((1, HID)),
        "final_ln_b": zeros((1, HID)),
        "head_w": head_w,
        "head_b": zeros((1, HEAD_PAD)),
    }


def pack_params(params):
    """Pack all weights into one (W_ROWS,128) slab and all vectors into one
    (V_ROWS,128) slab so the kernel takes exactly 3 input DMAs."""
    def pad128(a):
        return jnp.pad(a, ((0, 0), (0, HEAD_PAD - a.shape[1])))

    w_rows = [pad128(params["patch_w"])]
    for l in range(LAYERS):
        w_rows += [pad128(params["wqkv"][l]), pad128(params["wo"][l]),
                   pad128(params["wi"][l]), pad128(params["wout"][l])]
    w_rows.append(pad128(params["head_w"]))
    w_slab = jnp.concatenate(w_rows, axis=0)

    v_rows = [pad128(params["patch_b"]), pad128(params["cls_token"]),
              pad128(params["pos_emb"])]
    for l in range(LAYERS):
        v_rows += [pad128(params["ln1_g"][l]), pad128(params["ln1_b"][l]),
                   pad128(params["bqkv"][l]), pad128(params["bo"][l]),
                   pad128(params["ln2_g"][l]), pad128(params["ln2_b"][l]),
                   pad128(params["bi"][l]), pad128(params["bout"][l])]
    v_rows += [pad128(params["final_ln_g"]), pad128(params["final_ln_b"]),
               pad128(params["head_b"])]
    v_slab = jnp.concatenate(v_rows, axis=0)

    assert w_slab.shape == (W_ROWS, HEAD_PAD), w_slab.shape
    assert v_slab.shape == (V_ROWS, HEAD_PAD), v_slab.shape
    return {"w_slab": w_slab, "v_slab": v_slab}


if __name__ == "__main__":
    key = jax.random.PRNGKey(0)
    k_param, k_input = jax.random.split(key)
    params = init_params(k_param)
    packed = pack_params(params)
    x = jax.random.normal(k_input, (B, C, IMG, IMG), dtype=jnp.float32)

    birads, density = jax.jit(vit_classifier_forward)(packed, x)
    jax.block_until_ready((birads, density))

    assert birads.shape == (B, N_BIRADS)
    assert density.shape == (B, N_DENSITY)
    print("KERNEL_OK")
</pallas_src>

<mosaic_0001>
module attributes {stable_mosaic.version = 11 : i64} {
  func.func @_vit_forward_kernel(%arg0: i32, %arg1: memref<1x4x192xf32, #tpu.memory_space<vmem>>, %arg2: memref<544x128xf32, #tpu.memory_space<vmem>>, %arg3: memref<26x128xf32, #tpu.memory_space<vmem>>, %arg4: memref<1x1x128xf32, #tpu.memory_space<vmem>>) attributes {dimension_semantics = [#tpu.dimension_semantics<parallel>], iteration_bounds = array<i64: 2>, scalar_prefetch = 0 : i64, scratch_operands = 0 : i64, tpu.core_type = #tpu.core_type<tc>, window_params = [{transform_indices = @transform_0, window_bounds = array<i64: 1, 4, 192>}, {pipeline_mode = #tpu.pipeline_mode<synchronous>, transform_indices = @transform_1, window_bounds = array<i64: 544, 128>}, {pipeline_mode = #tpu.pipeline_mode<synchronous>, transform_indices = @transform_2, window_bounds = array<i64: 26, 128>}, {transform_indices = @transform_3, window_bounds = array<i64: 1, 1, 128>}]} {
    %c0 = arith.constant 0 : index
    %c0_0 = arith.constant 0 : index
    %c0_1 = arith.constant 0 : index
    %0 = vector.load %arg1[%c0, %c0_0, %c0_1] : memref<1x4x192xf32, #tpu.memory_space<vmem>>, vector<1x4x192xf32>
    %1 = vector.shape_cast %0 : vector<1x4x192xf32> to vector<4x192xf32>
    %c0_2 = arith.constant 0 : index
    %c0_3 = arith.constant 0 : index
    %2 = vector.load %arg2[%c0_2, %c0_3] : memref<544x128xf32, #tpu.memory_space<vmem>>, vector<192x32xf32>
    %cst = arith.constant dense<0.000000e+00> : vector<4x32xf32>
    %3 = tpu.matmul %1, %2, %cst {dimension_numbers = #tpu.dot_dimension_numbers<[1], [0], [0], [1], [0, 0, 1, 1], [], []>} : vector<4x192xf32>, vector<192x32xf32>, vector<4x32xf32> -> vector<4x32xf32>
    %c0_4 = arith.constant 0 : index
    %c0_5 = arith.constant 0 : index
    %4 = vector.load %arg3[%c0_4, %c0_5] : memref<26x128xf32, #tpu.memory_space<vmem>>, vector<1x32xf32>
    %5 = vector.broadcast %4 : vector<1x32xf32> to vector<4x32xf32>
    %6 = arith.addf %3, %5 : vector<4x32xf32>
    %c1 = arith.constant 1 : index
    %c0_6 = arith.constant 0 : index
    %7 = vector.load %arg3[%c1, %c0_6] : memref<26x128xf32, #tpu.memory_space<vmem>>, vector<1x32xf32>
    %c2 = arith.constant 2 : index
    %c0_7 = arith.constant 0 : index
    %8 = vector.load %arg3[%c2, %c0_7] : memref<26x128xf32, #tpu.memory_space<vmem>>, vector<1x32xf32>
    %9 = arith.addf %7, %8 : vector<1x32xf32>
    %c3 = arith.constant 3 : index
    %c0_8 = arith.constant 0 : index
    %10 = vector.load %arg3[%c3, %c0_8] : memref<26x128xf32, #tpu.memory_space<vmem>>, vector<4x32xf32>
    %11 = arith.addf %6, %10 : vector<4x32xf32>
    %12 = tpu.concatenate %9, %11 in 0 : vector<1x32xf32>, vector<4x32xf32> -> vector<5x32xf32>
    %13 = tpu.iota {dimensions = array<i32: 0>} : vector<20x20xi32>
    %14 = tpu.iota {dimensions = array<i32: 1>} : vector<20x20xi32>
    %c0_i32 = arith.constant 0 : i32
    %15 = vector.broadcast %c0_i32 : i32 to vector<20x20xi32>
    %16 = arith.cmpi sge, %13, %15 : vector<20x20xi32>
    %c5_i32 = arith.constant 5 : i32
    %17 = vector.broadcast %c5_i32 : i32 to vector<20x20xi32>
    %18 = arith.cmpi slt, %13, %17 : vector<20x20xi32>
    %19 = arith.andi %16, %18 : vector<20x20xi1>
    %c0_i32_9 = arith.constant 0 : i32
    %20 = vector.broadcast %c0_i32_9 : i32 to vector<20x20xi32>
    %21 = arith.cmpi sge, %14, %20 : vector<20x20xi32>
    %22 = arith.andi %19, %21 : vector<20x20xi1>
    %c5_i32_10 = arith.constant 5 : i32
    %23 = vector.broadcast %c5_i32_10 : i32 to vector<20x20xi32>
    %24 = arith.cmpi slt, %14, %23 : vector<20x20xi32>
    %25 = arith.andi %22, %24 : vector<20x20xi1>
    %c5_i32_11 = arith.constant 5 : i32
    %26 = vector.broadcast %c5_i32_11 : i32 to vector<20x20xi32>
    %27 = arith.cmpi sge, %13, %26 : vector<20x20xi32>
    %c10_i32 = arith.constant 10 : i32
    %28 = vector.broadcast %c10_i32 : i32 to vector<20x20xi32>
    %29 = arith.cmpi slt, %13, %28 : vector<20x20xi32>
    %30 = arith.andi %27, %29 : vector<20x20xi1>
    %c5_i32_12 = arith.constant 5 : i32
    %31 = vector.broadcast %c5_i32_12 : i32 to vector<20x20xi32>
    %32 = arith.cmpi sge, %14, %31 : vector<20x20xi32>
    %33 = arith.andi %30, %32 : vector<20x20xi1>
    %c10_i32_13 = arith.constant 10 : i32
    %34 = vector.broadcast %c10_i32_13 : i32 to vector<20x20xi32>
    %35 = arith.cmpi slt, %14, %34 : vector<20x20xi32>
    %36 = arith.andi %33, %35 : vector<20x20xi1>
    %37 = arith.ori %25, %36 : vector<20x20xi1>
    %c10_i32_14 = arith.constant 10 : i32
    %38 = vector.broadcast %c10_i32_14 : i32 to vector<20x20xi32>
    %39 = arith.cmpi sge, %13, %38 : vector<20x20xi32>
    %c15_i32 = arith.constant 15 : i32
    %40 = vector.broadcast %c15_i32 : i32 to vector<20x20xi32>
    %41 = arith.cmpi slt, %13, %40 : vector<20x20xi32>
    %42 = arith.andi %39, %41 : vector<20x20xi1>
    %c10_i32_15 = arith.constant 10 : i32
    %43 = vector.broadcast %c10_i32_15 : i32 to vector<20x20xi32>
    %44 = arith.cmpi sge, %14, %43 : vector<20x20xi32>
    %45 = arith.andi %42, %44 : vector<20x20xi1>
    %c15_i32_16 = arith.constant 15 : i32
    %46 = vector.broadcast %c15_i32_16 : i32 to vector<20x20xi32>
    %47 = arith.cmpi slt, %14, %46 : vector<20x20xi32>
    %48 = arith.andi %45, %47 : vector<20x20xi1>
    %49 = arith.ori %37, %48 : vector<20x20xi1>
    %c15_i32_17 = arith.constant 15 : i32
    %50 = vector.broadcast %c15_i32_17 : i32 to vector<20x20xi32>
    %51 = arith.cmpi sge, %13, %50 : vector<20x20xi32>
    %c20_i32 = arith.constant 20 : i32
    %52 = vector.broadcast %c20_i32 : i32 to vector<20x20xi32>
    %53 = arith.cmpi slt, %13, %52 : vector<20x20xi32>
    %54 = arith.andi %51, %53 : vector<20x20xi1>
    %c15_i32_18 = arith.constant 15 : i32
    %55 = vector.broadcast %c15_i32_18 : i32 to vector<20x20xi32>
    %56 = arith.cmpi sge, %14, %55 : vector<20x20xi32>
    %57 = arith.andi %54, %56 : vector<20x20xi1>
    %c20_i32_19 = arith.constant 20 : i32
    %58 = vector.broadcast %c20_i32_19 : i32 to vector<20x20xi32>
    %59 = arith.cmpi slt, %14, %58 : vector<20x20xi32>
    %60 = arith.andi %57, %59 : vector<20x20xi1>
    %61 = arith.ori %49, %60 : vector<20x20xi1>
    %c7 = arith.constant 7 : index
    %c0_20 = arith.constant 0 : index
    %62 = vector.load %arg3[%c7, %c0_20] : memref<26x128xf32, #tpu.memory_space<vmem>>, vector<1x32xf32>
    %c8 = arith.constant 8 : index
    %c0_21 = arith.constant 0 : index
    %63 = vector.load %arg3[%c8, %c0_21] : memref<26x128xf32, #tpu.memory_space<vmem>>, vector<1x32xf32>
    %cst_22 = arith.constant dense<0.000000e+00> : vector<5xf32>
    %64 = vector.multi_reduction <add>, %12, %cst_22 [1] : vector<5x32xf32> to vector<5xf32>
    %65 = vector.shape_cast %64 : vector<5xf32> to vector<5x1xf32>
    %cst_23 = arith.constant 3.200000e+01 : f32
    %66 = vector.broadcast %cst_23 : f32 to vector<5x1xf32>
    %67 = arith.divf %65, %66 : vector<5x1xf32>
    %68 = vector.broadcast %67 : vector<5x1xf32> to vector<5x32xf32>
    %69 = arith.subf %12, %68 : vector<5x32xf32>
    %70 = arith.mulf %69, %69 : vector<5x32xf32>
    %cst_24 = arith.constant dense<0.000000e+00> : vector<5xf32>
    %71 = vector.multi_reduction <add>, %70, %cst_24 [1] : vector<5x32xf32> to vector<5xf32>
    %72 = vector.shape_cast %71 : vector<5xf32> to vector<5x1xf32>
    %cst_25 = arith.constant 3.200000e+01 : f32
    %73 = vector.broadcast %cst_25 : f32 to vector<5x1xf32>
    %74 = arith.divf %72, %73 : vector<5x1xf32>
    %75 = vector.broadcast %67 : vector<5x1xf32> to vector<5x32xf32>
    %76 = arith.subf %12, %75 : vector<5x32xf32>
    %cst_26 = arith.constant 9.99999996E-13 : f32
    %77 = vector.broadcast %cst_26 : f32 to vector<5x1xf32>
    %78 = arith.addf %74, %77 : vector<5x1xf32>
    %79 = math.rsqrt %78 : vector<5x1xf32>
    %80 = vector.broadcast %79 : vector<5x1xf32> to vector<5x32xf32>
    %81 = arith.mulf %76, %80 : vector<5x32xf32>
    %82 = vector.broadcast %62 : vector<1x32xf32> to vector<5x32xf32>
    %83 = arith.mulf %81, %82 : vector<5x32xf32>
    %84 = vector.broadcast %63 : vector<1x32xf32> to vector<5x32xf32>
    %85 = arith.addf %83, %84 : vector<5x32xf32>
    %c192 = arith.constant 192 : index
    %c0_27 = arith.constant 0 : index
    %86 = vector.load %arg2[%c192, %c0_27] : memref<544x128xf32, #tpu.memory_space<vmem>>, vector<32x96xf32>
    %cst_28 = arith.constant dense<0.000000e+00> : vector<5x96xf32>
    %87 = tpu.matmul %85, %86, %cst_28 {dimension_numbers = #tpu.dot_dimension_numbers<[1], [0], [0], [1], [0, 0, 1, 1], [], []>} : vector<5x32xf32>, vector<32x96xf32>, vector<5x96xf32> -> vector<5x96xf32>
    %c9 = arith.constant 9 : index
    %c0_29 = arith.constant 0 : index
    %88 = vector.load %arg3[%c9, %c0_29] : memref<26x128xf32, #tpu.memory_space<vmem>>, vector<1x96xf32>
    %89 = vector.broadcast %88 : vector<1x96xf32> to vector<5x96xf32>
    %90 = arith.addf %87, %89 : vector<5x96xf32>
    %91 = vector.extract_strided_slice %90 {offsets = [0, 0], sizes = [5, 8], strides = [1, 1]} : vector<5x96xf32> to vector<5x8xf32>
    %92 = vector.extract_strided_slice %90 {offsets = [0, 8], sizes = [5, 8], strides = [1, 1]} : vector<5x96xf32> to vector<5x8xf32>
    %93 = vector.extract_strided_slice %90 {offsets = [0, 16], sizes = [5, 8], strides = [1, 1]} : vector<5x96xf32> to vector<5x8xf32>
    %94 = vector.extract_strided_slice %90 {offsets = [0, 24], sizes = [5, 8], strides = [1, 1]} : vector<5x96xf32> to vector<5x8xf32>
    %95 = tpu.concatenate %91, %92, %93, %94 in 0 : vector<5x8xf32>, vector<5x8xf32>, vector<5x8xf32>, vector<5x8xf32> -> vector<20x8xf32>
    %96 = vector.extract_strided_slice %90 {offsets = [0, 32], sizes = [5, 8], strides = [1, 1]} : vector<5x96xf32> to vector<5x8xf32>
    %97 = vector.extract_strided_slice %90 {offsets = [0, 40], sizes = [5, 8], strides = [1, 1]} : vector<5x96xf32> to vector<5x8xf32>
    %98 = vector.extract_strided_slice %90 {offsets = [0, 48], sizes = [5, 8], strides = [1, 1]} : vector<5x96xf32> to vector<5x8xf32>
    %99 = vector.extract_strided_slice %90 {offsets = [0, 56], sizes = [5, 8], strides = [1, 1]} : vector<5x96xf32> to vector<5x8xf32>
    %100 = tpu.concatenate %96, %97, %98, %99 in 0 : vector<5x8xf32>, vector<5x8xf32>, vector<5x8xf32>, vector<5x8xf32> -> vector<20x8xf32>
    %101 = vector.extract_strided_slice %90 {offsets = [0, 64], sizes = [5, 8], strides = [1, 1]} : vector<5x96xf32> to vector<5x8xf32>
    %102 = vector.extract_strided_slice %90 {offsets = [0, 72], sizes = [5, 8], strides = [1, 1]} : vector<5x96xf32> to vector<5x8xf32>
    %103 = vector.extract_strided_slice %90 {offsets = [0, 80], sizes = [5, 8], strides = [1, 1]} : vector<5x96xf32> to vector<5x8xf32>
    %104 = vector.extract_strided_slice %90 {offsets = [0, 88], sizes = [5, 8], strides = [1, 1]} : vector<5x96xf32> to vector<5x8xf32>
    %105 = tpu.concatenate %101, %102, %103, %104 in 0 : vector<5x8xf32>, vector<5x8xf32>, vector<5x8xf32>, vector<5x8xf32> -> vector<20x8xf32>
    %cst_30 = arith.constant dense<0.000000e+00> : vector<20x20xf32>
    %106 = tpu.matmul %95, %100, %cst_30 {dimension_numbers = #tpu.dot_dimension_numbers<[1], [1], [0], [0], [0, 0, 1, 0], [], []>} : vector<20x8xf32>, vector<20x8xf32>, vector<20x20xf32> -> vector<20x20xf32>
    %cst_31 = arith.constant 0.353553385 : f32
    %107 = vector.broadcast %cst_31 : f32 to vector<20x20xf32>
    %108 = arith.mulf %106, %107 : vector<20x20xf32>
    %cst_32 = arith.constant -1.000000e+30 : f32
    %109 = vector.broadcast %cst_32 : f32 to vector<20x20xf32>
    %110 = arith.select %61, %108, %109 : vector<20x20xi1>, vector<20x20xf32>
    %cst_33 = arith.constant dense<0xFF800000> : vector<20xf32>
    %111 = vector.multi_reduction <maximumf>, %110, %cst_33 [1] : vector<20x20xf32> to vector<20xf32>
    %112 = vector.shape_cast %111 : vector<20xf32> to vector<20x1xf32>
    %113 = vector.broadcast %112 : vector<20x1xf32> to vector<20x20xf32>
    %114 = arith.subf %110, %113 : vector<20x20xf32>
    %115 = math.exp %114 : vector<20x20xf32>
    %cst_34 = arith.constant dense<0.000000e+00> : vector<20xf32>
    %116 = vector.multi_reduction <add>, %115, %cst_34 [1] : vector<20x20xf32> to vector<20xf32>
    %117 = vector.shape_cast %116 : vector<20xf32> to vector<20x1xf32>
    %118 = vector.broadcast %117 : vector<20x1xf32> to vector<20x20xf32>
    %119 = arith.divf %115, %118 : vector<20x20xf32>
    %cst_35 = arith.constant dense<0.000000e+00> : vector<20x8xf32>
    %120 = tpu.matmul %119, %105, %cst_35 {dimension_numbers = #tpu.dot_dimension_numbers<[1], [0], [0], [1], [0, 0, 1, 1], [], []>} : vector<20x20xf32>, vector<20x8xf32>, vector<20x8xf32> -> vector<20x8xf32>
    %121 = vector.extract_strided_slice %120 {offsets = [0, 0], sizes = [5, 8], strides = [1, 1]} : vector<20x8xf32> to vector<5x8xf32>
    %122 = vector.extract_strided_slice %120 {offsets = [5, 0], sizes = [5, 8], strides = [1, 1]} : vector<20x8xf32> to vector<5x8xf32>
    %123 = vector.extract_strided_slice %120 {offsets = [10, 0], sizes = [5, 8], strides = [1, 1]} : vector<20x8xf32> to vector<5x8xf32>
    %124 = vector.extract_strided_slice %120 {offsets = [15, 0], sizes = [5, 8], strides = [1, 1]} : vector<20x8xf32> to vector<5x8xf32>
    %125 = tpu.concatenate %121, %122, %123, %124 in 1 : vector<5x8xf32>, vector<5x8xf32>, vector<5x8xf32>, vector<5x8xf32> -> vector<5x32xf32>
    %c224 = arith.constant 224 : index
    %c0_36 = arith.constant 0 : index
    %126 = vector.load %arg2[%c224, %c0_36] : memref<544x128xf32, #tpu.memory_space<vmem>>, vector<32x32xf32>
    %cst_37 = arith.constant dense<0.000000e+00> : vector<5x32xf32>
    %127 = tpu.matmul %125, %126, %cst_37 {dimension_numbers = #tpu.dot_dimension_numbers<[1], [0], [0], [1], [0, 0, 1, 1], [], []>} : vector<5x32xf32>, vector<32x32xf32>, vector<5x32xf32> -> vector<5x32xf32>
    %c10 = arith.constant 10 : index
    %c0_38 = arith.constant 0 : index
    %128 = vector.load %arg3[%c10, %c0_38] : memref<26x128xf32, #tpu.memory_space<vmem>>, vector<1x32xf32>
    %129 = vector.broadcast %128 : vector<1x32xf32> to vector<5x32xf32>
    %130 = arith.addf %127, %129 : vector<5x32xf32>
    %131 = arith.addf %12, %130 : vector<5x32xf32>
    %c11 = arith.constant 11 : index
    %c0_39 = arith.constant 0 : index
    %132 = vector.load %arg3[%c11, %c0_39] : memref<26x128xf32, #tpu.memory_space<vmem>>, vector<1x32xf32>
    %c12 = arith.constant 12 : index
    %c0_40 = arith.constant 0 : index
    %133 = vector.load %arg3[%c12, %c0_40] : memref<26x128xf32, #tpu.memory_space<vmem>>, vector<1x32xf32>
    %cst_41 = arith.constant dense<0.000000e+00> : vector<5xf32>
    %134 = vector.multi_reduction <add>, %131, %cst_41 [1] : vector<5x32xf32> to vector<5xf32>
    %135 = vector.shape_cast %134 : vector<5xf32> to vector<5x1xf32>
    %cst_42 = arith.constant 3.200000e+01 : f32
    %136 = vector.broadcast %cst_42 : f32 to vector<5x1xf32>
    %137 = arith.divf %135, %136 : vector<5x1xf32>
    %138 = vector.broadcast %137 : vector<5x1xf32> to vector<5x32xf32>
    %139 = arith.subf %131, %138 : vector<5x32xf32>
    %140 = arith.mulf %139, %139 : vector<5x32xf32>
    %cst_43 = arith.constant dense<0.000000e+00> : vector<5xf32>
    %141 = vector.multi_reduction <add>, %140, %cst_43 [1] : vector<5x32xf32> to vector<5xf32>
    %142 = vector.shape_cast %141 : vector<5xf32> to vector<5x1xf32>
    %cst_44 = arith.constant 3.200000e+01 : f32
    %143 = vector.broadcast %cst_44 : f32 to vector<5x1xf32>
    %144 = arith.divf %142, %143 : vector<5x1xf32>
    %145 = vector.broadcast %137 : vector<5x1xf32> to vector<5x32xf32>
    %146 = arith.subf %131, %145 : vector<5x32xf32>
    %cst_45 = arith.constant 9.99999996E-13 : f32
    %147 = vector.broadcast %cst_45 : f32 to vector<5x1xf32>
    %148 = arith.addf %144, %147 : vector<5x1xf32>
    %149 = math.rsqrt %148 : vector<5x1xf32>
    %150 = vector.broadcast %149 : vector<5x1xf32> to vector<5x32xf32>
    %151 = arith.mulf %146, %150 : vector<5x32xf32>
    %152 = vector.broadcast %132 : vector<1x32xf32> to vector<5x32xf32>
    %153 = arith.mulf %151, %152 : vector<5x32xf32>
    %154 = vector.broadcast %133 : vector<1x32xf32> to vector<5x32xf32>
    %155 = arith.addf %153, %154 : vector<5x32xf32>
    %c256 = arith.constant 256 : index
    %c0_46 = arith.constant 0 : index
    %156 = vector.load %arg2[%c256, %c0_46] : memref<544x128xf32, #tpu.memory_space<vmem>>, vector<32x64xf32>
    %cst_47 = arith.constant dense<0.000000e+00> : vector<5x64xf32>
    %157 = tpu.matmul %155, %156, %cst_47 {dimension_numbers = #tpu.dot_dimension_numbers<[1], [0], [0], [1], [0, 0, 1, 1], [], []>} : vector<5x32xf32>, vector<32x64xf32>, vector<5x64xf32> -> vector<5x64xf32>
    %c13 = arith.constant 13 : index
    %c0_48 = arith.constant 0 : index
    %158 = vector.load %arg3[%c13, %c0_48] : memref<26x128xf32, #tpu.memory_space<vmem>>, vector<1x64xf32>
    %159 = vector.broadcast %158 : vector<1x64xf32> to vector<5x64xf32>
    %160 = arith.addf %157, %159 : vector<5x64xf32>
    %161 = arith.mulf %160, %160 : vector<5x64xf32>
    %162 = arith.mulf %160, %161 : vector<5x64xf32>
    %cst_49 = arith.constant 4.471500e-02 : f32
    %163 = vector.broadcast %cst_49 : f32 to vector<5x64xf32>
    %164 = arith.mulf %163, %162 : vector<5x64xf32>
    %165 = arith.addf %160, %164 : vector<5x64xf32>
    %cst_50 = arith.constant 0.797884583 : f32
    %166 = vector.broadcast %cst_50 : f32 to vector<5x64xf32>
    %167 = arith.mulf %166, %165 : vector<5x64xf32>
    %168 = math.tanh %167 : vector<5x64xf32>
    %cst_51 = arith.constant 1.000000e+00 : f32
    %169 = vector.broadcast %cst_51 : f32 to vector<5x64xf32>
    %170 = arith.addf %169, %168 : vector<5x64xf32>
    %cst_52 = arith.constant 5.000000e-01 : f32
    %171 = vector.broadcast %cst_52 : f32 to vector<5x64xf32>
    %172 = arith.mulf %171, %170 : vector<5x64xf32>
    %173 = arith.mulf %160, %172 : vector<5x64xf32>
    %c288 = arith.constant 288 : index
    %c0_53 = arith.constant 0 : index
    %174 = vector.load %arg2[%c288, %c0_53] : memref<544x128xf32, #tpu.memory_space<vmem>>, vector<64x32xf32>
    %cst_54 = arith.constant dense<0.000000e+00> : vector<5x32xf32>
    %175 = tpu.matmul %173, %174, %cst_54 {dimension_numbers = #tpu.dot_dimension_numbers<[1], [0], [0], [1], [0, 0, 1, 1], [], []>} : vector<5x64xf32>, vector<64x32xf32>, vector<5x32xf32> -> vector<5x32xf32>
    %c14 = arith.constant 14 : index
    %c0_55 = arith.constant 0 : index
    %176 = vector.load %arg3[%c14, %c0_55] : memref<26x128xf32, #tpu.memory_space<vmem>>, vector<1x32xf32>
    %177 = vector.broadcast %176 : vector<1x32xf32> to vector<5x32xf32>
    %178 = arith.addf %175, %177 : vector<5x32xf32>
    %179 = arith.addf %131, %178 : vector<5x32xf32>
    %c15 = arith.constant 15 : index
    %c0_56 = arith.constant 0 : index
    %180 = vector.load %arg3[%c15, %c0_56] : memref<26x128xf32, #tpu.memory_space<vmem>>, vector<1x32xf32>
    %c16 = arith.constant 16 : index
    %c0_57 = arith.constant 0 : index
    %181 = vector.load %arg3[%c16, %c0_57] : memref<26x128xf32, #tpu.memory_space<vmem>>, vector<1x32xf32>
    %cst_58 = arith.constant dense<0.000000e+00> : vector<5xf32>
    %182 = vector.multi_reduction <add>, %179, %cst_58 [1] : vector<5x32xf32> to vector<5xf32>
    %183 = vector.shape_cast %182 : vector<5xf32> to vector<5x1xf32>
    %cst_59 = arith.constant 3.200000e+01 : f32
    %184 = vector.broadcast %cst_59 : f32 to vector<5x1xf32>
    %185 = arith.divf %183, %184 : vector<5x1xf32>
    %186 = vector.broadcast %185 : vector<5x1xf32> to vector<5x32xf32>
    %187 = arith.subf %179, %186 : vector<5x32xf32>
    %188 = arith.mulf %187, %187 : vector<5x32xf32>
    %cst_60 = arith.constant dense<0.000000e+00> : vector<5xf32>
    %189 = vector.multi_reduction <add>, %188, %cst_60 [1] : vector<5x32xf32> to vector<5xf32>
    %190 = vector.shape_cast %189 : vector<5xf32> to vector<5x1xf32>
    %cst_61 = arith.constant 3.200000e+01 : f32
    %191 = vector.broadcast %cst_61 : f32 to vector<5x1xf32>
    %192 = arith.divf %190, %191 : vector<5x1xf32>
    %193 = vector.broadcast %185 : vector<5x1xf32> to vector<5x32xf32>
    %194 = arith.subf %179, %193 : vector<5x32xf32>
    %cst_62 = arith.constant 9.99999996E-13 : f32
    %195 = vector.broadcast %cst_62 : f32 to vector<5x1xf32>
    %196 = arith.addf %192, %195 : vector<5x1xf32>
    %197 = math.rsqrt %196 : vector<5x1xf32>
    %198 = vector.broadcast %197 : vector<5x1xf32> to vector<5x32xf32>
    %199 = arith.mulf %194, %198 : vector<5x32xf32>
    %200 = vector.broadcast %180 : vector<1x32xf32> to vector<5x32xf32>
    %201 = arith.mulf %199, %200 : vector<5x32xf32>
    %202 = vector.broadcast %181 : vector<1x32xf32> to vector<5x32xf32>
    %203 = arith.addf %201, %202 : vector<5x32xf32>
    %c352 = arith.constant 352 : index
    %c0_63 = arith.constant 0 : index
    %204 = vector.load %arg2[%c352, %c0_63] : memref<544x128xf32, #tpu.memory_space<vmem>>, vector<32x96xf32>
    %cst_64 = arith.constant dense<0.000000e+00> : vector<5x96xf32>
    %205 = tpu.matmul %203, %204, %cst_64 {dimension_numbers = #tpu.dot_dimension_numbers<[1], [0], [0], [1], [0, 0, 1, 1], [], []>} : vector<5x32xf32>, vector<32x96xf32>, vector<5x96xf32> -> vector<5x96xf32>
    %c17 = arith.constant 17 : index
    %c0_65 = arith.constant 0 : index
    %206 = vector.load %arg3[%c17, %c0_65] : memref<26x128xf32, #tpu.memory_space<vmem>>, vector<1x96xf32>
    %207 = vector.broadcast %206 : vector<1x96xf32> to vector<5x96xf32>
    %208 = arith.addf %205, %207 : vector<5x96xf32>
    %209 = vector.extract_strided_slice %208 {offsets = [0, 0], sizes = [5, 8], strides = [1, 1]} : vector<5x96xf32> to vector<5x8xf32>
    %210 = vector.extract_strided_slice %208 {offsets = [0, 8], sizes = [5, 8], strides = [1, 1]} : vector<5x96xf32> to vector<5x8xf32>
    %211 = vector.extract_strided_slice %208 {offsets = [0, 16], sizes = [5, 8], strides = [1, 1]} : vector<5x96xf32> to vector<5x8xf32>
    %212 = vector.extract_strided_slice %208 {offsets = [0, 24], sizes = [5, 8], strides = [1, 1]} : vector<5x96xf32> to vector<5x8xf32>
    %213 = tpu.concatenate %209, %210, %211, %212 in 0 : vector<5x8xf32>, vector<5x8xf32>, vector<5x8xf32>, vector<5x8xf32> -> vector<20x8xf32>
    %214 = vector.extract_strided_slice %208 {offsets = [0, 32], sizes = [5, 8], strides = [1, 1]} : vector<5x96xf32> to vector<5x8xf32>
    %215 = vector.extract_strided_slice %208 {offsets = [0, 40], sizes = [5, 8], strides = [1, 1]} : vector<5x96xf32> to vector<5x8xf32>
    %216 = vector.extract_strided_slice %208 {offsets = [0, 48], sizes = [5, 8], strides = [1, 1]} : vector<5x96xf32> to vector<5x8xf32>
    %217 = vector.extract_strided_slice %208 {offsets = [0, 56], sizes = [5, 8], strides = [1, 1]} : vector<5x96xf32> to vector<5x8xf32>
    %218 = tpu.concatenate %214, %215, %216, %217 in 0 : vector<5x8xf32>, vector<5x8xf32>, vector<5x8xf32>, vector<5x8xf32> -> vector<20x8xf32>
    %219 = vector.extract_strided_slice %208 {offsets = [0, 64], sizes = [5, 8], strides = [1, 1]} : vector<5x96xf32> to vector<5x8xf32>
    %220 = vector.extract_strided_slice %208 {offsets = [0, 72], sizes = [5, 8], strides = [1, 1]} : vector<5x96xf32> to vector<5x8xf32>
    %221 = vector.extract_strided_slice %208 {offsets = [0, 80], sizes = [5, 8], strides = [1, 1]} : vector<5x96xf32> to vector<5x8xf32>
    %222 = vector.extract_strided_slice %208 {offsets = [0, 88], sizes = [5, 8], strides = [1, 1]} : vector<5x96xf32> to vector<5x8xf32>
    %223 = tpu.concatenate %219, %220, %221, %222 in 0 : vector<5x8xf32>, vector<5x8xf32>, vector<5x8xf32>, vector<5x8xf32> -> vector<20x8xf32>
    %cst_66 = arith.constant dense<0.000000e+00> : vector<20x20xf32>
    %224 = tpu.matmul %213, %218, %cst_66 {dimension_numbers = #tpu.dot_dimension_numbers<[1], [1], [0], [0], [0, 0, 1, 0], [], []>} : vector<20x8xf32>, vector<20x8xf32>, vector<20x20xf32> -> vector<20x20xf32>
    %cst_67 = arith.constant 0.353553385 : f32
    %225 = vector.broadcast %cst_67 : f32 to vector<20x20xf32>
    %226 = arith.mulf %224, %225 : vector<20x20xf32>
    %cst_68 = arith.constant -1.000000e+30 : f32
    %227 = vector.broadcast %cst_68 : f32 to vector<20x20xf32>
    %228 = arith.select %61, %226, %227 : vector<20x20xi1>, vector<20x20xf32>
    %cst_69 = arith.constant dense<0xFF800000> : vector<20xf32>
    %229 = vector.multi_reduction <maximumf>, %228, %cst_69 [1] : vector<20x20xf32> to vector<20xf32>
    %230 = vector.shape_cast %229 : vector<20xf32> to vector<20x1xf32>
    %231 = vector.broadcast %230 : vector<20x1xf32> to vector<20x20xf32>
    %232 = arith.subf %228, %231 : vector<20x20xf32>
    %233 = math.exp %232 : vector<20x20xf32>
    %cst_70 = arith.constant dense<0.000000e+00> : vector<20xf32>
    %234 = vector.multi_reduction <add>, %233, %cst_70 [1] : vector<20x20xf32> to vector<20xf32>
    %235 = vector.shape_cast %234 : vector<20xf32> to vector<20x1xf32>
    %236 = vector.broadcast %235 : vector<20x1xf32> to vector<20x20xf32>
    %237 = arith.divf %233, %236 : vector<20x20xf32>
    %cst_71 = arith.constant dense<0.000000e+00> : vector<20x8xf32>
    %238 = tpu.matmul %237, %223, %cst_71 {dimension_numbers = #tpu.dot_dimension_numbers<[1], [0], [0], [1], [0, 0, 1, 1], [], []>} : vector<20x20xf32>, vector<20x8xf32>, vector<20x8xf32> -> vector<20x8xf32>
    %239 = vector.extract_strided_slice %238 {offsets = [0, 0], sizes = [5, 8], strides = [1, 1]} : vector<20x8xf32> to vector<5x8xf32>
    %240 = vector.extract_strided_slice %238 {offsets = [5, 0], sizes = [5, 8], strides = [1, 1]} : vector<20x8xf32> to vector<5x8xf32>
    %241 = vector.extract_strided_slice %238 {offsets = [10, 0], sizes = [5, 8], strides = [1, 1]} : vector<20x8xf32> to vector<5x8xf32>
    %242 = vector.extract_strided_slice %238 {offsets = [15, 0], sizes = [5, 8], strides = [1, 1]} : vector<20x8xf32> to vector<5x8xf32>
    %243 = tpu.concatenate %239, %240, %241, %242 in 1 : vector<5x8xf32>, vector<5x8xf32>, vector<5x8xf32>, vector<5x8xf32> -> vector<5x32xf32>
    %c384 = arith.constant 384 : index
    %c0_72 = arith.constant 0 : index
    %244 = vector.load %arg2[%c384, %c0_72] : memref<544x128xf32, #tpu.memory_space<vmem>>, vector<32x32xf32>
    %cst_73 = arith.constant dense<0.000000e+00> : vector<5x32xf32>
    %245 = tpu.matmul %243, %244, %cst_73 {dimension_numbers = #tpu.dot_dimension_numbers<[1], [0], [0], [1], [0, 0, 1, 1], [], []>} : vector<5x32xf32>, vector<32x32xf32>, vector<5x32xf32> -> vector<5x32xf32>
    %c18 = arith.constant 18 : index
    %c0_74 = arith.constant 0 : index
    %246 = vector.load %arg3[%c18, %c0_74] : memref<26x128xf32, #tpu.memory_space<vmem>>, vector<1x32xf32>
    %247 = vector.broadcast %246 : vector<1x32xf32> to vector<5x32xf32>
    %248 = arith.addf %245, %247 : vector<5x32xf32>
    %249 = arith.addf %179, %248 : vector<5x32xf32>
    %c19 = arith.constant 19 : index
    %c0_75 = arith.constant 0 : index
    %250 = vector.load %arg3[%c19, %c0_75] : memref<26x128xf32, #tpu.memory_space<vmem>>, vector<1x32xf32>
    %c20 = arith.constant 20 : index
    %c0_76 = arith.constant 0 : index
    %251 = vector.load %arg3[%c20, %c0_76] : memref<26x128xf32, #tpu.memory_space<vmem>>, vector<1x32xf32>
    %cst_77 = arith.constant dense<0.000000e+00> : vector<5xf32>
    %252 = vector.multi_reduction <add>, %249, %cst_77 [1] : vector<5x32xf32> to vector<5xf32>
    %253 = vector.shape_cast %252 : vector<5xf32> to vector<5x1xf32>
    %cst_78 = arith.constant 3.200000e+01 : f32
    %254 = vector.broadcast %cst_78 : f32 to vector<5x1xf32>
    %255 = arith.divf %253, %254 : vector<5x1xf32>
    %256 = vector.broadcast %255 : vector<5x1xf32> to vector<5x32xf32>
    %257 = arith.subf %249, %256 : vector<5x32xf32>
    %258 = arith.mulf %257, %257 : vector<5x32xf32>
    %cst_79 = arith.constant dense<0.000000e+00> : vector<5xf32>
    %259 = vector.multi_reduction <add>, %258, %cst_79 [1] : vector<5x32xf32> to vector<5xf32>
    %260 = vector.shape_cast %259 : vector<5xf32> to vector<5x1xf32>
    %cst_80 = arith.constant 3.200000e+01 : f32
    %261 = vector.broadcast %cst_80 : f32 to vector<5x1xf32>
    %262 = arith.divf %260, %261 : vector<5x1xf32>
    %263 = vector.broadcast %255 : vector<5x1xf32> to vector<5x32xf32>
    %264 = arith.subf %249, %263 : vector<5x32xf32>
    %cst_81 = arith.constant 9.99999996E-13 : f32
    %265 = vector.broadcast %cst_81 : f32 to vector<5x1xf32>
    %266 = arith.addf %262, %265 : vector<5x1xf32>
    %267 = math.rsqrt %266 : vector<5x1xf32>
    %268 = vector.broadcast %267 : vector<5x1xf32> to vector<5x32xf32>
    %269 = arith.mulf %264, %268 : vector<5x32xf32>
    %270 = vector.broadcast %250 : vector<1x32xf32> to vector<5x32xf32>
    %271 = arith.mulf %269, %270 : vector<5x32xf32>
    %272 = vector.broadcast %251 : vector<1x32xf32> to vector<5x32xf32>
    %273 = arith.addf %271, %272 : vector<5x32xf32>
    %c416 = arith.constant 416 : index
    %c0_82 = arith.constant 0 : index
    %274 = vector.load %arg2[%c416, %c0_82] : memref<544x128xf32, #tpu.memory_space<vmem>>, vector<32x64xf32>
    %cst_83 = arith.constant dense<0.000000e+00> : vector<5x64xf32>
    %275 = tpu.matmul %273, %274, %cst_83 {dimension_numbers = #tpu.dot_dimension_numbers<[1], [0], [0], [1], [0, 0, 1, 1], [], []>} : vector<5x32xf32>, vector<32x64xf32>, vector<5x64xf32> -> vector<5x64xf32>
    %c21 = arith.constant 21 : index
    %c0_84 = arith.constant 0 : index
    %276 = vector.load %arg3[%c21, %c0_84] : memref<26x128xf32, #tpu.memory_space<vmem>>, vector<1x64xf32>
    %277 = vector.broadcast %276 : vector<1x64xf32> to vector<5x64xf32>
    %278 = arith.addf %275, %277 : vector<5x64xf32>
    %279 = arith.mulf %278, %278 : vector<5x64xf32>
    %280 = arith.mulf %278, %279 : vector<5x64xf32>
    %cst_85 = arith.constant 4.471500e-02 : f32
    %281 = vector.broadcast %cst_85 : f32 to vector<5x64xf32>
    %282 = arith.mulf %281, %280 : vector<5x64xf32>
    %283 = arith.addf %278, %282 : vector<5x64xf32>
    %cst_86 = arith.constant 0.797884583 : f32
    %284 = vector.broadcast %cst_86 : f32 to vector<5x64xf32>
    %285 = arith.mulf %284, %283 : vector<5x64xf32>
    %286 = math.tanh %285 : vector<5x64xf32>
    %cst_87 = arith.constant 1.000000e+00 : f32
    %287 = vector.broadcast %cst_87 : f32 to vector<5x64xf32>
    %288 = arith.addf %287, %286 : vector<5x64xf32>
    %cst_88 = arith.constant 5.000000e-01 : f32
    %289 = vector.broadcast %cst_88 : f32 to vector<5x64xf32>
    %290 = arith.mulf %289, %288 : vector<5x64xf32>
    %291 = arith.mulf %278, %290 : vector<5x64xf32>
    %c448 = arith.constant 448 : index
    %c0_89 = arith.constant 0 : index
    %292 = vector.load %arg2[%c448, %c0_89] : memref<544x128xf32, #tpu.memory_space<vmem>>, vector<64x32xf32>
    %cst_90 = arith.constant dense<0.000000e+00> : vector<5x32xf32>
    %293 = tpu.matmul %291, %292, %cst_90 {dimension_numbers = #tpu.dot_dimension_numbers<[1], [0], [0], [1], [0, 0, 1, 1], [], []>} : vector<5x64xf32>, vector<64x32xf32>, vector<5x32xf32> -> vector<5x32xf32>
    %c22 = arith.constant 22 : index
    %c0_91 = arith.constant 0 : index
    %294 = vector.load %arg3[%c22, %c0_91] : memref<26x128xf32, #tpu.memory_space<vmem>>, vector<1x32xf32>
    %295 = vector.broadcast %294 : vector<1x32xf32> to vector<5x32xf32>
    %296 = arith.addf %293, %295 : vector<5x32xf32>
    %297 = arith.addf %249, %296 : vector<5x32xf32>
    %298 = vector.extract_strided_slice %297 {offsets = [0, 0], sizes = [1, 32], strides = [1, 1]} : vector<5x32xf32> to vector<1x32xf32>
    %c23 = arith.constant 23 : index
    %c0_92 = arith.constant 0 : index
    %299 = vector.load %arg3[%c23, %c0_92] : memref<26x128xf32, #tpu.memory_space<vmem>>, vector<1x32xf32>
    %c24 = arith.constant 24 : index
    %c0_93 = arith.constant 0 : index
    %300 = vector.load %arg3[%c24, %c0_93] : memref<26x128xf32, #tpu.memory_space<vmem>>, vector<1x32xf32>
    %cst_94 = arith.constant dense<0.000000e+00> : vector<1xf32>
    %301 = vector.multi_reduction <add>, %298, %cst_94 [1] : vector<1x32xf32> to vector<1xf32>
    %302 = vector.shape_cast %301 : vector<1xf32> to vector<1x1xf32>
    %cst_95 = arith.constant 3.200000e+01 : f32
    %303 = vector.broadcast %cst_95 : f32 to vector<1x1xf32>
    %304 = arith.divf %302, %303 : vector<1x1xf32>
    %305 = vector.broadcast %304 : vector<1x1xf32> to vector<1x32xf32>
    %306 = arith.subf %298, %305 : vector<1x32xf32>
    %307 = arith.mulf %306, %306 : vector<1x32xf32>
    %cst_96 = arith.constant dense<0.000000e+00> : vector<1xf32>
    %308 = vector.multi_reduction <add>, %307, %cst_96 [1] : vector<1x32xf32> to vector<1xf32>
    %309 = vector.shape_cast %308 : vector<1xf32> to vector<1x1xf32>
    %cst_97 = arith.constant 3.200000e+01 : f32
    %310 = vector.broadcast %cst_97 : f32 to vector<1x1xf32>
    %311 = arith.divf %309, %310 : vector<1x1xf32>
    %312 = vector.broadcast %304 : vector<1x1xf32> to vector<1x32xf32>
    %313 = arith.subf %298, %312 : vector<1x32xf32>
    %cst_98 = arith.constant 9.99999996E-13 : f32
    %314 = vector.broadcast %cst_98 : f32 to vector<1x1xf32>
    %315 = arith.addf %311, %314 : vector<1x1xf32>
    %316 = math.rsqrt %315 : vector<1x1xf32>
    %317 = vector.broadcast %316 : vector<1x1xf32> to vector<1x32xf32>
    %318 = arith.mulf %313, %317 : vector<1x32xf32>
    %319 = arith.mulf %318, %299 : vector<1x32xf32>
    %320 = arith.addf %319, %300 : vector<1x32xf32>
    %c512 = arith.constant 512 : index
    %c0_99 = arith.constant 0 : index
    %321 = vector.load %arg2[%c512, %c0_99] : memref<544x128xf32, #tpu.memory_space<vmem>>, vector<32x128xf32>
    %cst_100 = arith.constant dense<0.000000e+00> : vector<1x128xf32>
    %322 = tpu.matmul %320, %321, %cst_100 {dimension_numbers = #tpu.dot_dimension_numbers<[1], [0], [0], [1], [0, 0, 1, 1], [], []>} : vector<1x32xf32>, vector<32x128xf32>, vector<1x128xf32> -> vector<1x128xf32>
    %c25 = arith.constant 25 : index
    %c0_101 = arith.constant 0 : index
    %323 = vector.load %arg3[%c25, %c0_101] : memref<26x128xf32, #tpu.memory_space<vmem>>, vector<1x128xf32>
    %324 = arith.addf %322, %323 : vector<1x128xf32>
    %325 = vector.shape_cast %324 : vector<1x128xf32> to vector<1x1x128xf32>
    %c0_102 = arith.constant 0 : index
    %c0_103 = arith.constant 0 : index
    %c0_104 = arith.constant 0 : index
    %326 = vector.load %arg4[%c0_102, %c0_103, %c0_104] : memref<1x1x128xf32, #tpu.memory_space<vmem>>, vector<1x1x128xf32>
    tpu.vector_store %arg4[%c0_102, %c0_103, %c0_104], %325 {strides = array<i32>} : memref<1x1x128xf32, #tpu.memory_space<vmem>>, vector<1x1x128xf32>,
    return
  }
  func.func @transform_0(%arg0: i32) -> (i32, i32, i32) {
    %c0_i32 = arith.constant 0 : i32
    %c0_i32_0 = arith.constant 0 : i32
    %c0_i32_1 = arith.constant 0 : i32
    return %arg0, %c0_i32, %c0_i32_0 : i32, i32, i32
  }
  func.func @transform_1(%arg0: i32) -> (i32, i32) {
    %c0_i32 = arith.constant 0 : i32
    %c0_i32_0 = arith.constant 0 : i32
    %c0_i32_1 = arith.constant 0 : i32
    return %c0_i32, %c0_i32_0 : i32, i32
  }
  func.func @transform_2(%arg0: i32) -> (i32, i32) {
    %c0_i32 = arith.constant 0 : i32
    %c0_i32_0 = arith.constant 0 : i32
    %c0_i32_1 = arith.constant 0 : i32
    return %c0_i32, %c0_i32_0 : i32, i32
  }
  func.func @transform_3(%arg0: i32) -> (i32, i32, i32) {
    %c0_i32 = arith.constant 0 : i32
    %c0_i32_0 = arith.constant 0 : i32
    %c0_i32_1 = arith.constant 0 : i32
    return %arg0, %c0_i32, %c0_i32_0 : i32, i32, i32
  }
}

</mosaic_0001>

<bundles_post_ra>
// kernel: vit_classifier_forward.1
= control target key start
LH: loop header
LB: loop body
LE: loop exit
PB: predicated region body
PF: predicated region fallthrough
CT: control target
= control target key end

     0   :  { %s2402_s12 = smov 0   ;;  %s2957_s0 = inlined_call_operand.vmem [shape: f32[2,4,192], index: 0, kind: input, shape index: {}]   ;;  %s2958_s1 = inlined_call_operand.vmem [shape: f32[544,128], index: 1, kind: input, shape index: {}]   ;;  %s2959_s2 = inlined_call_operand.vmem [shape: f32[26,128], index: 2, kind: input, shape index: {}]   ;;  %s2960_s3 = inlined_call_operand.vmem [shape: f32[2,1,128], index: 3, kind: output, shape index: {}]  }
   0x1 LB: > { %s1860_s13 = sadd.s32 4294967295, %s2369_s12   ;;  %p1864_p0 = scmp.ge.s32.totalorder %s2369_s12, 1  ;;  %s2369_s12 = sphi %s2402_s12, %s13_s12  }
   0x2   : > { %p137_p1 = scmp.lt.s32.totalorder %s2369_s12, 3 }
   0x4   : > { %p138_p2 = pnand %p1864_p0, %p137_p1 }
   0x5   : > { %v168_v0 = vld [vmem:[%s2958_s1] sm:$0xff] (!%p138_p2)  ;;  %v169_v1 = vld [vmem:[%s2958_s1 + $0x8] sm:$0xff] (!%p138_p2)  ;;  %v170_v2 = vld [vmem:[%s2958_s1 + $0x10] sm:$0xff] (!%p138_p2)  ;;  %p159_p3 = scmp.lt.s32.totalorder (!%p138_p2), %s1860_s13, 1  ;;  %v2371_v3 = vmov (!%p138_p2), 0.0|0.0   ;;  %vm2964_vm0 = vcmask (!%p138_p2), 523264  }
   0x6   : > { %141 = sbr.rel (%p138_p2) target bundleno = 6083 (0x17c3), region = 32  ;;  %2169 = vmatprep.subr.bf16.mxu0 (!%p138_p2), %v2371_v3  ;;  %v2170_v4 = vpack.c.bf16 (!%p138_p2), %v169_v1, %v168_v0  ;;  %v171_v5 = vld [vmem:[%s2958_s1 + $0x18] sm:$0xff] (!%p138_p2)  ;;  %2205 = vmatprep.subr.bf16.mxu1 (!%p138_p2), %v2371_v3  ;;  %v172_v7 = vld [vmem:[%s2958_s1 + $0x20] sm:$0xff] (!%p138_p2)  ;;  %v173_v8 = vld [vmem:[%s2958_s1 + $0x28] sm:$0xff] (!%p138_p2)  ;;  %vm2968_vm1 = vcmask (!%p138_p2), 1040384   ;;  %vm2965_vm2 = vcmask (!%p138_p2), 258048  }
   0x7   : > { %v2173_v6 = vpack.c.bf16 (!%p138_p2), %v171_v5, %v170_v2  ;;  %v2176_v9 = vpack.c.bf16 (!%p138_p2), %v173_v8, %v172_v7  ;;  %v174_v10 = vld [vmem:[%s2958_s1 + $0x30] sm:$0xff] (!%p138_p2)  ;;  %v175_v11 = vld [vmem:[%s2958_s1 + $0x38] sm:$0xff] (!%p138_p2)  ;;  %v176_v15 = vld [vmem:[%s2958_s1 + $0x40] sm:$0xff] (!%p138_p2)  ;;  %vm2969_vm3 = vmmov (!%p138_p2), 0   ;;  %v2373_v61 = vmov (!%p138_p2), 0.0   ;;  %s2374_s11 = smov (!%p138_p2), 104  }
   0x8   : > { %2171 = vmatpush1.bf16.msra.mxu0 (!%p138_p2), %v2170_v4  ;;  %v2179_v14 = vpack.c.bf16 (!%p138_p2), %v175_v11, %v174_v10  ;;  %v177_v16 = vld [vmem:[%s2958_s1 + $0x48] sm:$0xff] (!%p138_p2)  ;;  %v178_v18 = vld [vmem:[%s2958_s1 + $0x50] sm:$0xff] (!%p138_p2)  ;;  %v179_v19 = vld [vmem:[%s2958_s1 + $0x58] sm:$0xff] (!%p138_p2)  ;;  %2002 = vmatprep.mubr.msk.f32.mxu1 (!%p138_p2), %vm2969_vm3, %v2373_v61  ;;  %vm2966_vm4 = vcmask (!%p138_p2), 261120   ;;  %s2375_s14 = smov (!%p138_p2), 120   ;;  %s2376_s15 = smov (!%p138_p2), 112  }
   0x9   : > { %2172 = vmatprep.subr.bf16.mxu0 (!%p138_p2), %v2371_v3  ;;  %v2182_v17 = vpack.c.bf16 (!%p138_p2), %v177_v16, %v176_v15  ;;  %v2185_v20 = vpack.c.bf16 (!%p138_p2), %v179_v19, %v178_v18  ;;  %v180_v21 = vld [vmem:[%s2958_s1 + $0x60] sm:$0xff] (!%p138_p2)  ;;  %v181_v22 = vld [vmem:[%s2958_s1 + $0x68] sm:$0xff] (!%p138_p2)  ;;  %v182_v24 = vld [vmem:[%s2958_s1 + $0x70] sm:$0xff] (!%p138_p2)  ;;  %vm2963_vm5 = vcmask (!%p138_p2), 1041408   ;;  %vm2962_vm6 = vcmask (!%p138_p2), 1044480   ;;  %s2377_s16 = smov (!%p138_p2), 96  }
   0xa   : > { %v2188_v23 = vpack.c.bf16 (!%p138_p2), %v181_v22, %v180_v21  ;;  %v183_v25 = vld [vmem:[%s2958_s1 + $0x78] sm:$0xff] (!%p138_p2)  ;;  %v184_v27 = vld [vmem:[%s2958_s1 + $0x80] sm:$0xff] (!%p138_p2)  ;;  %v185_v28 = vld [vmem:[%s2958_s1 + $0x88] sm:$0xff] (!%p138_p2)  ;;  %vm2961_vm7 = vcmask (!%p138_p2), 1046528   ;;  %vm2967_vm8 = vcmask (!%p138_p2), 64512   ;;  %s2378_s17 = smov (!%p138_p2), 64  }
   0xb   : > { %v2191_v26 = vpack.c.bf16 (!%p138_p2), %v183_v25, %v182_v24  ;;  %v2194_v29 = vpack.c.bf16 (!%p138_p2), %v185_v28, %v184_v27  ;;  %v186_v30 = vld [vmem:[%s2958_s1 + $0x90] sm:$0xff] (!%p138_p2)  ;;  %v187_v31 = vld [vmem:[%s2958_s1 + $0x98] sm:$0xff] (!%p138_p2)  ;;  %v188_v33 = vld [vmem:[%s2958_s1 + $0xa0] sm:$0xff] (!%p138_p2)  ;;  %s2380_s27 = smov (!%p138_p2), 16   ;;  %s2381_s28 = smov (!%p138_p2), 24  }
   0xc   : > { %2174 = vmatpush1.bf16.msra.mxu0 (!%p138_p2), %v2173_v6  ;;  %v2197_v32 = vpack.c.bf16 (!%p138_p2), %v187_v31, %v186_v30  ;;  %v189_v34 = vld [vmem:[%s2958_s1 + $0xa8] sm:$0xff] (!%p138_p2)  ;;  %v190_v36 = vld [vmem:[%s2958_s1 + $0xb0] sm:$0xff] (!%p138_p2)  ;;  %v191_v37 = vld [vmem:[%s2958_s1 + $0xb8] sm:$0xff] (!%p138_p2) }
   0xd   : > { %s3016_s13 = smov (!%p159_p3, %s1860_s13), 1  ;;  %2175 = vmatprep.subr.bf16.mxu0 %v2371_v3  ;;  %v2200_v35 = vpack.c.bf16 %v189_v34, %v188_v33  ;;  %v2203_v38 = vpack.c.bf16 %v191_v37, %v190_v36  ;;  %v1867_v39 = vld [vmem:[%s2959_s2] ss:$0 sm:$0xff]  ;;  %v275_v40 = vld [vmem:[%s2959_s2 + $0x3] sm:$0xf]  ;;  %v393_v57 = vld [vmem:[%s2958_s1 + $0xc8] sm:$0xff] }
   0xe   : > { %s1916_s26 = sshll.u32 %s3016_s13, 3  ;;  %v272_v42 = vld [vmem:[%s2959_s2 + $0x1] sm:$0x1]  ;;  %v273_v43 = vld [vmem:[%s2959_s2 + $0x2] sm:$0x1]  ;;  %v394_v58 = vld [vmem:[%s2958_s1 + $0xd0] sm:$0xff] }
   0xf   : > { %s163_s29 = scalar_lea.vmem %s2957_s0, %s1916_s26  ;;  %v274_v47 = vadd.f32 %v273_v43, %v272_v42  ;;  %v392_v56 = vld [vmem:[%s2958_s1 + $0xc0] sm:$0xff]  ;;  %v395_v60 = vld [vmem:[%s2958_s1 + $0xd8] sm:$0xff]  ;;  %v1870_v6 = vld [vmem:[%s2959_s2 + $0x8] ss:$0 sm:$0xff]  ;;  %v2976_v33 = vmov 0  ;;  %s2379_s26 = smov 8  }
  0x10   : > { %v167_v12 = vld [vmem:[%s163_s29] sm:$0xff]  ;;  %2177 = vmatpush1.bf16.msra.mxu0 %v2176_v9  ;;  %v2206_v59 = vpack.c.bf16 %v393_v57, %v392_v56  ;;  %v2209_v62 = vpack.c.bf16 %v395_v60, %v394_v58  ;;  %v1871_v9 = vld [vmem:[%s2959_s2 + $0x9] ss:$0 sm:$0xff]  ;;  %vm2569_vm9 = vmpackc.low %vm2967_vm8, %vm2967_vm8 }
  0x11   : > { %v198_v13 = vcombine.high %v167_v12, %v167_v12  ;;  %2178 = vmatprep.subr.bf16.mxu0 %v2371_v3  ;;  %v1869_v4 = vld [vmem:[%s2959_s2 + $0x7] ss:$0 sm:$0xff] }
  0x12   : > { %2207 = vmatpush3.bf16.msra.mxu1 %v2206_v59 }
  0x13   : > { %1868 = vmatprep.mubr.msk.f32.mxu0 %vm2964_vm0, %v198_v13  ;;  %2208 = vmatprep.subr.bf16.mxu1 %v2371_v3 }
  0x14   : > { %2180 = vmatpush1.bf16.msra.mxu0 %v2179_v14 }
  0x15   : > { %2181 = vmatprep.subr.bf16.mxu0 %v2371_v3 }
  0x16   : > { %2210 = vmatpush3.bf16.msra.mxu1 %v2209_v62 }
  0x17   : > { %2211 = vmatprep.subr.bf16.mxu1 %v2371_v3 }
  0x18   : > { %2183 = vmatpush1.bf16.msra.mxu0 %v2182_v17 }
  0x19   : > { %2184 = vmatprep.subr.bf16.mxu0 %v2371_v3 }
  0x1c   : > { %2186 = vmatpush1.bf16.msra.mxu0 %v2185_v20 }
  0x1d   : > { %2187 = vmatprep.subr.bf16.mxu0 %v2371_v3 }
  0x20   : > { %2189 = vmatpush1.bf16.msra.mxu0 %v2188_v23 }
  0x21   : > { %2190 = vmatprep.subr.bf16.mxu0 %v2371_v3 }
  0x24   : > { %2192 = vmatpush1.bf16.msra.mxu0 %v2191_v26  ;;  %v2974_v26 = vmov 0 }
  0x25   : > { %2193 = vmatprep.subr.bf16.mxu0 %v2371_v3  ;;  %v2975_v26 = vsel %vm2569_vm9, 4294967295, %v2974_v26 }
  0x28   : > { %2195 = vmatpush1.bf16.msra.mxu0 %v2194_v29  ;;  %v282_v29 = vlaneseq }
  0x29   : > { %2196 = vmatprep.subr.bf16.mxu0 %v2371_v3 }
  0x2a   : > { %v283_v30 = vshrl.u32 %v282_v29, 7  ;;  %v287_v31 = vand.u32 127, %v282_v29 }
  0x2c   : > { %2198 = vmatpush1.bf16.msra.mxu0 %v2197_v32  ;;  %v284_v32 = vadd.s32 8, %v283_v30  ;;  %vm305_vm10 = vcmp.ge.s32.totalorder %v283_v30, 5  ;;  %vm314_vm11 = vcmp.ge.s32.totalorder %v287_v31, 5  ;;  %vm291_vm14 = vcmp.lt.s32.totalorder %v283_v30, 5 }
  0x2d   : > { %2199 = vmatprep.subr.bf16.mxu0 %v2371_v3  ;;  %vm301_vm15 = vcmp.lt.s32.totalorder %v287_v31, 5  ;;  %vm334_vm0 = vcmp.ge.s32.totalorder %v287_v31, 10  ;;  %v285_v37 = vadd.s32 16, %v283_v30 }
  0x2e   : > { %vm326_vm12 = vcmp.ge.s32.totalorder %v284_v32, 10  ;;  %vm329_vm13 = vcmp.lt.s32.totalorder %v284_v32, 15 }
  0x30   : > { %2201 = vmatpush1.bf16.msra.mxu0 %v2200_v35 }
  0x31   : > { %2202 = vmatprep.subr.bf16.mxu0 %v2371_v3 }
  0x34   : > { %2204 = vmatpush1.bf16.msra.mxu0 %v2203_v38 }
  0x35   : > { %2230 = vmatprep.subr.bf16.mxu0 %v2371_v3 }
  0x37   : > { %267 = vmatmul.mubr.f32.vlgmr.msra.gmra.mrb[0].mxu0 %v167_v12 }
  0x38   : > { %2073 = vmatprep.mubr.msk.f32.mxu0 %vm2969_vm3, %v2373_v61 }
 0x10a   : > { %v268_v41 = vpop.f32.mrb[0].mxu0 }
 0x10b   : > { %v269_v44 = vadd.f32 %v1867_v39, %v268_v41  ;;  %v270_v45 = vpop.f32.mrb[1].mxu0 }
 0x10d   : > { %v276_v46 = vadd.f32 %v275_v40, %v269_v44 }
 0x10f   : > { %v278_v48 = vrot.slane %v276_v46, 7 }
 0x111   : > { %v2516_v49 = vsel %vm2968_vm1, %v274_v47, %v278_v48 }
 0x112   : > { %v368_v50 = vsel %vm2965_vm2, %v2516_v49, 0.0 }
 0x113   : > { %369 = vadd.xlane.f32.xlu0 %v368_v50 }
 0x1a0   : > { %v370_v51 = vpop.xlane.xlu0 %369 }
 0x1a1   : > { %v372_v52 = vmul.f32 0.03125, %v370_v51 }
 0x1a3   : > { %v373_v53 = vsub.f32 %v2516_v49, %v372_v52 }
 0x1a5   : > { %v374_v54 = vmul.f32 %v373_v53, %v373_v53 }
 0x1a7   : > { %v375_v55 = vsel %vm2965_vm2, %v374_v54, 0.0  ;;  %vm2588_vm2 = vmand %vm291_vm14, %vm301_vm15 }
 0x1a8   : > { %376 = vadd.xlane.f32.xlu0 %v375_v55  ;;  %v2977_v33 = vsel %vm2588_vm2, 4294967295, %v2976_v33  ;;  %vm358_vm2 = vcmp.lt.s32.totalorder %v287_v31, 20 }
 0x235   : > { %v377_v63 = vpop.xlane.xlu0 %376 }
 0x236   : > { %v378_v0 = vmul.f32 0.03125, %v377_v63 }
 0x238   : > { %v379_v1 = vadd.f32 1e-12, %v378_v0 }
 0x23a   : > { %2325 = vrsqrt.f32 %v379_v1 }
 0x244   : > { %v2326_v2 = vpop.eup %2325 }
 0x245   : > { %v381_v5 = vmul.f32 %v2326_v2, %v373_v53 }
 0x247   : > { %v386_v7 = vmul.f32 %v1869_v4, %v381_v5 }
 0x249   : > { %v391_v8 = vadd.f32 %v1870_v6, %v386_v7 }
 0x24b   : > { %2003 = vmatmul.mubr.msk.f32.vlgmr.msra.gmra.mrb[0].mxu1 %vm2966_vm4, %v391_v8  ;;  %vm318_vm4 = vcmp.lt.s32.totalorder %v287_v31, 10 }
 0x24c   : > { %2011 = vmatprep.mubr.msk.f32.mxu1 %vm2969_vm3, %v2373_v61 }
 0x31e   : > { %v471_v10 = vpop.f32.mrb[0].mxu1 }
 0x31f   : > { %v472_v11 = vadd.f32 %v1871_v9, %v471_v10  ;;  %v2004_v12 = vpop.f32.mrb[1].mxu1 }
 0x321   : > { %v484_v13 = vrot.slane %v472_v11, 1  ;;  %v476_v14 = vrot.slane %v472_v11, 3  ;;  %v480_v15 = vrot.slane %v472_v11, 6 }
 0x323   : > { %485 = vrot.lane.b32.xlu0 %v484_v13, %s2374_s11  ;;  %477 = vrot.lane.b32.xlu1 %v476_v14, %s2375_s14 }
 0x327   : > { %481 = vrot.lane.b32.xlu1 %v480_v15, %s2376_s15 }
 0x395   : > { %v478_v16 = vpop.permute.xlu1 %477  ;;  %v2555_v18 = vpop.permute.xlu0 %485 }
 0x396   : > { %v489_v20 = vsel %vm2962_vm6, %v472_v11, %v478_v16  ;;  %vm309_vm6 = vcmp.lt.s32.totalorder %v284_v32, 10 }
 0x399   : > { %v482_v17 = vpop.permute.xlu1 %481 }
 0x39a   : > { %v491_v19 = vsel %vm2963_vm5, %v478_v16, %v482_v17  ;;  %vm332_vm5 = vmand %vm326_vm12, %vm329_vm13  ;;  %vm354_vm12 = vcmp.ge.s32.totalorder %v287_v31, 15 }
 0x39b   : > { %v493_v21 = vsel %vm2961_vm7, %v491_v19, %v2555_v18  ;;  %vm315_vm7 = vmand %vm305_vm10, %vm314_vm11  ;;  %vm346_vm10 = vcmp.ge.s32.totalorder %v284_v32, 15 }
 0x39c   : > { %v2561_v22 = vpack.i.bf16 %v493_v21, %v489_v20  ;;  %vm336_vm1 = vmand %vm332_vm5, %vm334_vm0  ;;  %vm2984_vm0 = vnez %v2977_v33 }
 0x39d   : > { %vm356_vm15 = vmand %vm346_vm10, %vm354_vm12  ;;  %vm608_vm10 = vcmask 158720  }
 0x39e   : > { %2305 = vrot.lane.b32.xlu1 %v2561_v22, %s2377_s16 }
 0x3a2   : > { %500 = vrot.lane.b32.xlu1 %v2555_v18, %s2377_s16 }
 0x410   : > { %v2306_v23 = vpop.permute.xlu1 %2305 }
 0x411   : > { %v2308_v24 = vunpack.i.h.bf16 %v2306_v23  ;;  %v2307_v25 = vunpack.i.l.bf16 %v2306_v23  ;;  %v761_v23 = vld [vmem:[%s2958_s1 + $0xe0] sm:$0xff] }
 0x413   : > { %v2212_v27 = vpack.c.bf16 %v2308_v24, %v2307_v25  ;;  %v762_v24 = vld [vmem:[%s2958_s1 + $0xe8] sm:$0xff] }
 0x414   : > { %v501_v28 = vpop.permute.xlu1 %500  ;;  %v2219_v25 = vpack.c.bf16 %v762_v24, %v761_v23  ;;  %v964_v23 = vld [vmem:[%s2958_s1 + $0x140] sm:$0xff]  ;;  %v965_v24 = vld [vmem:[%s2958_s1 + $0x148] sm:$0xff] }
 0x415   : > { %2214 = vmatpush3.bf16.xpose.msk.msra.mxu1 %vm2569_vm9, %v2212_v27  ;;  %vm2592_vm9 = vmand %vm315_vm7, %vm318_vm4  ;;  %v763_v27 = vld [vmem:[%s2958_s1 + $0xf0] sm:$0xff] }
 0x416   : > { %2009 = vmatprep.subr.mxu1 %v2373_v61  ;;  %vm322_vm5 = vmor %vm2984_vm0, %vm2592_vm9  ;;  %vm3006_vm9 = vcmask 1040384  }
 0x41d   : > { %2010 = vmatpush3.xpose.msk.msra.mxu1 %vm2967_vm8, %v501_v28  ;;  %v764_v28 = vld [vmem:[%s2958_s1 + $0xf8] sm:$0xff] }
 0x41e   : > { %2215 = vmatprep.subr.bf16.mxu1 %v2371_v3  ;;  %v2222_v29 = vpack.c.bf16 %v764_v28, %v763_v27  ;;  %v966_v27 = vld [vmem:[%s2958_s1 + $0x150] sm:$0xff]  ;;  %v967_v28 = vld [vmem:[%s2958_s1 + $0x158] sm:$0xff] }
 0x420   : > { %2012 = vmatmul.mubr.msk.f32.vlgmr.msra.gmra.mrb[2].mxu1 %vm2967_vm8, %v489_v20 }
 0x421   : > { %2014 = vmatprep.mubr.msk.f32.mxu1 %vm2969_vm3, %v2373_v61 }
 0x424   : > { %2015 = vmatmul.mubr.msk.f32.gmra.mrb[4].mxu1 %vm2967_vm8, %v493_v21 }
 0x425   : > { %2017 = vmatprep.mubr.msk.f32.mxu1 %vm2969_vm3, %v2373_v61 }
 0x428   : > { %2018 = vmatmul.mubr.msk.f32.gmra.mrb[6].mxu1 %vm2967_vm8, %v2555_v18  ;;  %vm316_vm8 = vmand %vm309_vm6, %vm314_vm11  ;;  %vm350_vm6 = vcmp.lt.s32.totalorder %v285_v37, 20 }
 0x429   : > { %2026 = vmatprep.mubr.msk.f32.mxu1 %vm2969_vm3, %v2373_v61  ;;  %vm338_vm3 = vcmp.lt.s32.totalorder %v287_v31, 15  ;;  %vm2596_vm13 = vmand %vm316_vm8, %vm318_vm4 }
 0x42a   : > { %vm2600_vm14 = vmand %vm336_vm1, %vm338_vm3  ;;  %vm601_vm1 = vcmask 162816  }
 0x42b   : > { %vm343_vm4 = vmor %vm2596_vm13, %vm2600_vm14  ;;  %vm738_vm13 = vcmask 1042432   ;;  %vm2990_vm14 = vcmask 1040384  }
 0x42c   : > { %vm360_vm3 = vmand %vm356_vm15, %vm358_vm2  ;;  %vm757_vm15 = vcmask 130048  }
 0x42d   : > { %vm2620_vm7 = vmor %vm343_vm4, %vm360_vm3  ;;  %vm2973_vm4 = vcmask 195584   ;;  %vm2991_vm3 = vcmask 64512  }
 0x42e   : > { %vm357_vm8 = vmand %vm350_vm6, %vm354_vm12  ;;  %vm2989_vm12 = vmmov 0   ;;  %vm2992_vm6 = vcmask 261120  }
 0x42f   : > { %vm2629_vm11 = vmand %vm357_vm8, %vm358_vm2  ;;  %vm653_vm2 = vcmask 1043456   ;;  %vm2993_vm8 = vcmask 258048  }
 0x4f3   : > { %v581_v38 = vpop.f32.mrb[2].mxu1 }
 0x4f4   : > { %v595_v39 = vmul.f32 0.35355338, %v581_v38  ;;  %v2013_v40 = vpop.f32.mrb[3].mxu1 }
 0x4f6   : > { %v598_v41 = vsel %vm322_vm5, %v595_v39, -1e+30 }
 0x4f7   : > { %v586_v42 = vpop.f32.mrb[4].mxu1  ;;  %v602_v43 = vsel %vm601_vm1, %v598_v41, -inf }
 0x4f8   : > { %v596_v45 = vmul.f32 0.35355338, %v586_v42  ;;  %603 = vmax.xlane.f32.xlu1 %v602_v43  ;;  %v2016_v46 = vpop.f32.mrb[5].mxu1 }
 0x4fa   : > { %v599_v47 = vsel %vm2620_vm7, %v596_v45, -1e+30 }
 0x4fb   : > { %v591_v48 = vpop.f32.mrb[6].mxu1  ;;  %v605_v50 = vsel %vm601_vm1, %v599_v47, -inf }
 0x4fc   : > { %v597_v52 = vmul.f32 0.35355338, %v591_v48  ;;  %606 = vmax.xlane.f32.xlu0 %v605_v50  ;;  %v2019_v53 = vpop.f32.mrb[7].mxu1 }
 0x4fe   : > { %v600_v54 = vsel %vm2629_vm11, %v597_v52, -1e+30 }
 0x4ff   : > { %v609_v55 = vsel %vm608_vm10, %v600_v54, -inf }
 0x500   : > { %610 = vmax.xlane.f32.xlu1 %v609_v55 }
 0x585   : > { %v604_v56 = vpop.xlane.xlu1 %603 }
 0x586   : > { %v612_v57 = vsub.f32 %v598_v41, %v604_v56 }
 0x588   : > { %v615_v58 = vmul.f32 1.442695, %v612_v57 }
 0x589   : > { %v607_v59 = vpop.xlane.xlu0 %606 }
 0x58a   : > { %2327 = vpow2.f32 %v615_v58  ;;  %v613_v60 = vsub.f32 %v599_v47, %v607_v59 }
 0x58c   : > { %v617_v62 = vmul.f32 1.442695, %v613_v60 }
 0x58d   : > { %v611_v63 = vpop.xlane.xlu1 %610 }
 0x58e   : > { %2329 = vpow2.f32 %v617_v62  ;;  %v614_v0 = vsub.f32 %v600_v54, %v611_v63  ;;  %v1883_v54 = vld [vmem:[%s2959_s2 + $0xa] ss:$0 sm:$0xff] }
 0x590   : > { %v619_v1 = vmul.f32 1.442695, %v614_v0 }
 0x592   : > { %2331 = vpow2.f32 %v619_v1 }
 0x594   : > { %v2328_v2 = vpop.eup %2327 }
 0x595   : > { %v621_v4 = vsel %vm601_vm1, %v2328_v2, 0.0 }
 0x596   : > { %622 = vadd.xlane.f32.xlu1 %v621_v4 }
 0x598   : > { %v2330_v5 = vpop.eup %2329 }
 0x599   : > { %v624_v6 = vsel %vm601_vm1, %v2330_v5, 0.0 }
 0x59a   : > { %625 = vadd.xlane.f32.xlu1 %v624_v6  ;;  %v872_v6 = vld [vmem:[%s2958_s1 + $0x118] sm:$0xff] }
 0x59c   : > { %v2332_v7 = vpop.eup %2331 }
 0x59d   : > { %v627_v8 = vsel %vm608_vm10, %v2332_v7, 0.0 }
 0x59e   : > { %628 = vadd.xlane.f32.xlu0 %v627_v8 }
 0x5ab   : > { %2310 = vrot.lane.b32.xlu1 %v2561_v22, %s2378_s17 }
 0x5b4   : > { %640 = vrot.lane.b32.xlu0 %v2555_v18, %s2378_s17 }
 0x623   : > { %v623_v9 = vpop.xlane.xlu1 %622 }
 0x624   : > { %2333 = vrcp.f32 %v623_v9 }
 0x627   : > { %v626_v10 = vpop.xlane.xlu1 %625 }
 0x628   : > { %2335 = vrcp.f32 %v626_v10 }
 0x62b   : > { %v629_v11 = vpop.xlane.xlu0 %628  ;;  %v2311_v12 = vpop.permute.xlu1 %2310 }
 0x62c   : > { %v2313_v13 = vunpack.i.h.bf16 %v2311_v12  ;;  %v2312_v14 = vunpack.i.l.bf16 %v2311_v12  ;;  %2337 = vrcp.f32 %v629_v11  ;;  %v1885_v12 = vld [vmem:[%s2959_s2 + $0xb] ss:$0 sm:$0xff] }
 0x62e   : > { %v2216_v15 = vpack.c.bf16 %v2313_v13, %v2312_v14  ;;  %v2334_v16 = vpop.eup %2333  ;;  %v1886_v14 = vld [vmem:[%s2959_s2 + $0xc] ss:$0 sm:$0xff] }
 0x62f   : > { %v631_v17 = vmul.f32 %v2334_v16, %v2328_v2  ;;  %v641_v19 = vpop.permute.xlu0 %640  ;;  %v869_v2 = vld [vmem:[%s2958_s1 + $0x100] sm:$0xff] }
 0x630   : > { %2217 = vmatpush3.bf16.msra.mxu1 %v2216_v15 }
 0x631   : > { %2024 = vmatprep.subr.mxu1 %v2373_v61 }
 0x632   : > { %v2336_v20 = vpop.eup %2335 }
 0x633   : > { %v633_v18 = vmul.f32 %v2336_v20, %v2330_v5  ;;  %v871_v5 = vld [vmem:[%s2958_s1 + $0x110] sm:$0xff] }
 0x634   : > { %2025 = vmatpush3.msk.msra.mxu1 %vm653_vm2, %v641_v19  ;;  %v961_v19 = vld [vmem:[%s2958_s1 + $0x128] sm:$0xff] }
 0x635   : > { %2027 = vmatmul.mubr.msk.f32.vlgmr.msra.gmra.mrb[8].mxu1 %vm601_vm1, %v631_v17  ;;  %2218 = vmatprep.subr.bf16.mxu1 %v2371_v3  ;;  %v960_v17 = vld [vmem:[%s2958_s1 + $0x120] sm:$0xff] }
 0x636   : > { %2029 = vmatprep.mubr.msk.f32.mxu1 %vm2989_vm12, %v2373_v61  ;;  %v2338_v21 = vpop.eup %2337  ;;  %2220 = vmatpush3.bf16.msra.mxu1 %v2219_v25  ;;  %v2231_v20 = vpack.c.bf16 %v961_v19, %v960_v17  ;;  %v2237_v25 = vpack.c.bf16 %v965_v24, %v964_v23 }
 0x637   : > { %v635_v22 = vmul.f32 %v2338_v21, %v2332_v7  ;;  %2221 = vmatprep.subr.bf16.mxu1 %v2371_v3  ;;  %v2228_v7 = vpack.c.bf16 %v872_v6, %v871_v5  ;;  %v963_v21 = vld [vmem:[%s2958_s1 + $0x138] sm:$0xff]  ;;  %v1891_v6 = vld [vmem:[%s2959_s2 + $0xf] ss:$0 sm:$0xff] }
 0x638   : > { %2232 = vmatpush3.bf16.msra.mxu0 %v2231_v20 }
 0x639   : > { %2030 = vmatmul.mubr.msk.f32.gmra.mrb[10].mxu1 %vm601_vm1, %v633_v18  ;;  %2233 = vmatprep.subr.bf16.mxu0 %v2371_v3  ;;  %v962_v18 = vld [vmem:[%s2958_s1 + $0x130] sm:$0xff] }
 0x63a   : > { %2032 = vmatprep.mubr.msk.f32.mxu1 %vm2989_vm12, %v2373_v61  ;;  %2223 = vmatpush3.bf16.msra.mxu1 %v2222_v29  ;;  %v2240_v29 = vpack.c.bf16 %v967_v28, %v966_v27 }
 0x63b   : > { %2224 = vmatprep.subr.bf16.mxu1 %v2371_v3 }
 0x63d   : > { %2033 = vmatmul.mubr.msk.f32.gmra.mrb[12].mxu1 %vm601_vm1, %v635_v22  ;;  %v2234_v22 = vpack.c.bf16 %v963_v21, %v962_v18 }
 0x63e   : > { %2043 = vmatprep.mubr.msk.f32.mxu1 %vm2989_vm12, %v2373_v61 }
 0x63f   : > { %2235 = vmatpush3.bf16.msra.mxu0 %v2234_v22 }
 0x640   : > { %2236 = vmatprep.subr.bf16.mxu0 %v2371_v3 }
 0x643   : > { %2238 = vmatpush3.bf16.msra.mxu0 %v2237_v25 }
 0x644   : > { %2239 = vmatprep.subr.bf16.mxu0 %v2371_v3 }
 0x647   : > { %2241 = vmatpush3.bf16.msra.mxu0 %v2240_v29 }
 0x648   : > { %2252 = vmatprep.subr.bf16.mxu0 %v2371_v3 }
 0x708   : > { %v722_v30 = vpop.f32.mrb[8].mxu1 }
 0x709   : > { %v2028_v31 = vpop.f32.mrb[9].mxu1  ;;  %v739_v35 = vrot.slane %v722_v30, 5 }
 0x70c   : > { %v727_v32 = vpop.f32.mrb[10].mxu1 }
 0x70d   : > { %v740_v36 = vrot.slane %v727_v32, 5  ;;  %v2031_v37 = vpop.f32.mrb[11].mxu1  ;;  %v750_v40 = vrot.slane %v727_v32, 7  ;;  %v745_v43 = vrot.slane %v727_v32, 2 }
 0x70f   : > { %v741_v38 = vsel %vm738_vm13, %v739_v35, %v740_v36 }
 0x710   : > { %742 = vrot.lane.b32.xlu1 %v741_v38, %s2379_s26  ;;  %v732_v39 = vpop.f32.mrb[12].mxu1 }
 0x711   : > { %v751_v41 = vrot.slane %v732_v39, 7  ;;  %v2034_v42 = vpop.f32.mrb[13].mxu1 }
 0x713   : > { %v752_v45 = vsel %vm2990_vm14, %v750_v40, %v751_v41  ;;  %vm2994_vm14 = vmmov %vm2993_vm8 }
 0x714   : > { %746 = vrot.lane.b32.xlu1 %v745_v43, %s2380_s27  ;;  %753 = vrot.lane.b32.xlu0 %v752_v45, %s2381_s28 }
 0x782   : > { %v743_v46 = vpop.permute.xlu1 %742 }
 0x783   : > { %v756_v47 = vsel %vm2991_vm3, %v722_v30, %v743_v46  ;;  %vm2995_vm3 = vmmov %vm2992_vm6  ;;  %v1887_v30 = vld [vmem:[%s2959_s2 + $0xd] ss:$0 sm:$0xff]  ;;  %v1889_v46 = vld [vmem:[%s2959_s2 + $0xe] ss:$0 sm:$0xff] }
 0x786   : > { %v747_v48 = vpop.permute.xlu1 %746  ;;  %v754_v50 = vpop.permute.xlu0 %753 }
 0x787   : > { %v758_v52 = vsel %vm757_vm15, %v756_v47, %v747_v48 }
 0x788   : > { %v760_v53 = vsel %vm2973_vm4, %v758_v52, %v754_v50 }
 0x789   : > { %2044 = vmatmul.mubr.msk.f32.vlgmr.msra.gmra.mrb[14].mxu1 %vm2992_vm6, %v760_v53  ;;  %vm2996_vm6 = vcmask 523264  }
 0x78a   : > { %2054 = vmatprep.mubr.msk.f32.mxu1 %vm2989_vm12, %v2373_v61 }
 0x85c   : > { %v839_v55 = vpop.f32.mrb[14].mxu1 }
 0x85d   : > { %v840_v56 = vadd.f32 %v1883_v54, %v839_v55  ;;  %v2045_v57 = vpop.f32.mrb[15].mxu1 }
 0x85f   : > { %v2684_v58 = vadd.f32 %v840_v56, %v2516_v49  ;;  %v870_v49 = vld [vmem:[%s2958_s1 + $0x108] sm:$0xff] }
 0x860   : > { %v2225_v4 = vpack.c.bf16 %v870_v49, %v869_v2 }
 0x861   : > { %v846_v59 = vsel %vm2993_vm8, %v2684_v58, 0.0 }
 0x862   : > { %847 = vadd.xlane.f32.xlu1 %v846_v59  ;;  %2226 = vmatpush3.bf16.msra.mxu1 %v2225_v4 }
 0x863   : > { %2227 = vmatprep.subr.bf16.mxu1 %v2371_v3 }
 0x866   : > { %2229 = vmatpush3.bf16.msra.mxu1 %v2228_v7 }
 0x867   : > { %2242 = vmatprep.subr.bf16.mxu1 %v2371_v3 }
 0x8ef   : > { %v848_v60 = vpop.xlane.xlu1 %847 }
 0x8f0   : > { %v849_v62 = vmul.f32 0.03125, %v848_v60  ;;  %v1072_v60 = vld [vmem:[%s2958_s1 + $0x160] sm:$0xff] }
 0x8f2   : > { %v850_v63 = vsub.f32 %v2684_v58, %v849_v62 }
 0x8f4   : > { %v851_v0 = vmul.f32 %v850_v63, %v850_v63 }
 0x8f6   : > { %v852_v1 = vsel %vm2994_vm14, %v851_v0, 0.0  ;;  %vm2997_vm14 = vmmov %vm2993_vm8  ;;  %v1075_v0 = vld [vmem:[%s2958_s1 + $0x178] sm:$0xff] }
 0x8f7   : > { %853 = vadd.xlane.f32.xlu0 %v852_v1 }
 0x984   : > { %v854_v8 = vpop.xlane.xlu0 %853 }
 0x985   : > { %v855_v9 = vmul.f32 0.03125, %v854_v8  ;;  %v1892_v8 = vld [vmem:[%s2959_s2 + $0x10] ss:$0 sm:$0xff] }
 0x987   : > { %v856_v10 = vadd.f32 1e-12, %v855_v9 }
 0x989   : > { %2339 = vrsqrt.f32 %v856_v10 }
 0x993   : > { %v2340_v11 = vpop.eup %2339 }
 0x994   : > { %v858_v13 = vmul.f32 %v2340_v11, %v850_v63  ;;  %v1074_v63 = vld [vmem:[%s2958_s1 + $0x170] sm:$0xff] }
 0x995   : > { %v2246_v1 = vpack.c.bf16 %v1075_v0, %v1074_v63  ;;  %v1893_v11 = vld [vmem:[%s2959_s2 + $0x11] ss:$0 sm:$0xff] }
 0x996   : > { %v863_v15 = vmul.f32 %v1885_v12, %v858_v13 }
 0x998   : > { %v868_v16 = vadd.f32 %v1886_v14, %v863_v15 }
 0x99a   : > { %2055 = vmatmul.mubr.msk.f32.vlgmr.msra.gmra.mrb[16].mxu1 %vm2995_vm3, %v868_v16 }
 0x99b   : > { %2084 = vmatprep.mubr.msk.f32.mxu1 %vm2989_vm12, %v2373_v61 }
 0xa6d   : > { %v947_v31 = vpop.f32.mrb[16].mxu1 }
 0xa6e   : > { %v948_v32 = vadd.f32 %v1887_v30, %v947_v31  ;;  %v2056_v35 = vpop.f32.mrb[17].mxu1 }
 0xa70   : > { %v951_v36 = vmul.f32 %v948_v32, %v948_v32 }
 0xa72   : > { %v952_v37 = vmul.f32 %v951_v36, %v948_v32 }
 0xa74   : > { %v953_v38 = vmul.f32 0.044715, %v952_v37 }
 0xa76   : > { %v954_v39 = vadd.f32 %v953_v38, %v948_v32 }
 0xa78   : > { %v955_v40 = vmul.f32 0.7978846, %v954_v39 }
 0xa7a   : > { %2341 = vtanh.f32 %v955_v40 }
 0xa84   : > { %v2342_v41 = vpop.eup %2341 }
 0xa85   : > { %v957_v42 = vadd.f32 1.0, %v2342_v41 }
 0xa87   : > { %v958_v43 = vmul.f32 0.5, %v957_v42 }
 0xa89   : > { %v959_v45 = vmul.f32 %v958_v43, %v948_v32 }
 0xa8b   : > { %2074 = vmatmul.mubr.msk.f32.vlgmr.msra.gmra.mrb[2].mxu0 %vm2996_vm6, %v959_v45  ;;  %vm2998_vm6 = vcmask 1041408  }
 0xa8c   : > { %2108 = vmatprep.mubr.msk.f32.mxu0 %vm2989_vm12, %v2373_v61 }
 0xb5e   : > { %v1042_v47 = vpop.f32.mrb[2].mxu0 }
 0xb5f   : > { %v1043_v48 = vadd.f32 %v1889_v46, %v1042_v47  ;;  %v2075_v50 = vpop.f32.mrb[3].mxu0 }
 0xb61   : > { %v2751_v52 = vadd.f32 %v1043_v48, %v2684_v58  ;;  %v1073_v58 = vld [vmem:[%s2958_s1 + $0x168] sm:$0xff] }
 0xb62   : > { %v2243_v62 = vpack.c.bf16 %v1073_v58, %v1072_v60 }
 0xb63   : > { %v1049_v53 = vsel %vm2993_vm8, %v2751_v52, 0.0  ;;  %vm2999_vm8 = vcmask 1044480  }
 0xb64   : > { %1050 = vadd.xlane.f32.xlu0 %v1049_v53  ;;  %2244 = vmatpush3.bf16.msra.mxu1 %v2243_v62 }
 0xb65   : > { %2245 = vmatprep.subr.bf16.mxu1 %v2371_v3 }
 0xb68   : > { %2247 = vmatpush3.bf16.msra.mxu1 %v2246_v1 }
 0xb69   : > { %2248 = vmatprep.subr.bf16.mxu1 %v2371_v3 }
 0xbf1   : > { %v1051_v54 = vpop.xlane.xlu0 %1050 }
 0xbf2   : > { %v1052_v55 = vmul.f32 0.03125, %v1051_v54 }
 0xbf4   : > { %v1053_v56 = vsub.f32 %v2751_v52, %v1052_v55 }
 0xbf6   : > { %v1054_v57 = vmul.f32 %v1053_v56, %v1053_v56 }
 0xbf8   : > { %v1055_v59 = vsel %vm2997_vm14, %v1054_v57, 0.0  ;;  %vm3000_vm14 = vcmask 1046528  }
 0xbf9   : > { %1056 = vadd.xlane.f32.xlu1 %v1055_v59 }
 0xc86   : > { %v1057_v2 = vpop.xlane.xlu1 %1056 }
 0xc87   : > { %v1058_v49 = vmul.f32 0.03125, %v1057_v2 }
 0xc89   : > { %v1059_v4 = vadd.f32 1e-12, %v1058_v49 }
 0xc8b   : > { %2343 = vrsqrt.f32 %v1059_v4 }
 0xc95   : > { %v2344_v5 = vpop.eup %2343 }
 0xc96   : > { %v1061_v7 = vmul.f32 %v2344_v5, %v1053_v56 }
 0xc98   : > { %v1066_v9 = vmul.f32 %v1891_v6, %v1061_v7 }
 0xc9a   : > { %v1071_v10 = vadd.f32 %v1892_v8, %v1066_v9 }
 0xc9c   : > { %2085 = vmatmul.mubr.msk.f32.vlgmr.msra.gmra.mrb[18].mxu1 %vm2995_vm3, %v1071_v10  ;;  %vm3001_vm3 = vnez %v2975_v26 }
 0xc9d   : > { %2093 = vmatprep.mubr.msk.f32.mxu1 %vm2989_vm12, %v2373_v61 }
 0xd6f   : > { %v1150_v12 = vpop.f32.mrb[18].mxu1 }
 0xd70   : > { %v1151_v13 = vadd.f32 %v1893_v11, %v1150_v12  ;;  %v2086_v14 = vpop.f32.mrb[19].mxu1 }
 0xd71   : > { %v1431_v14 = vld [vmem:[%s2958_s1 + $0x188] sm:$0xff] }
 0xd72   : > { %v1159_v15 = vrot.slane %v1151_v13, 6  ;;  %v1155_v16 = vrot.slane %v1151_v13, 3  ;;  %v1163_v17 = vrot.slane %v1151_v13, 1 }
 0xd74   : > { %1160 = vrot.lane.b32.xlu1 %v1159_v15, %s2376_s15  ;;  %1156 = vrot.lane.b32.xlu0 %v1155_v16, %s2375_s14  ;;  %v1432_v16 = vld [vmem:[%s2958_s1 + $0x190] sm:$0xff] }
 0xd78   : > { %1164 = vrot.lane.b32.xlu1 %v1163_v17, %s2374_s11  ;;  %v1433_v17 = vld [vmem:[%s2958_s1 + $0x198] sm:$0xff] }
 0xde6   : > { %v1161_v19 = vpop.permute.xlu1 %1160  ;;  %v1157_v20 = vpop.permute.xlu0 %1156 }
 0xde7   : > { %v1168_v18 = vsel %vm2998_vm6, %v1157_v20, %v1161_v19  ;;  %v1167_v22 = vsel %vm2999_vm8, %v1151_v13, %v1157_v20  ;;  %vm3002_vm6 = vcmask 64512   ;;  %v1430_v13 = vld [vmem:[%s2958_s1 + $0x180] sm:$0xff]  ;;  %v2259_v19 = vpack.c.bf16 %v1433_v17, %v1432_v16 }
 0xde8   : > { %vm3003_vm8 = vmmov %vm3002_vm6  ;;  %v2256_v15 = vpack.c.bf16 %v1431_v14, %v1430_v13  ;;  %v1909_v13 = vld [vmem:[%s2959_s2 + $0x15] ss:$0 sm:$0xff] }
 0xde9   : > { %vm3005_vm4 = vmmov %vm3002_vm6 }
 0xdea   : > { %v1165_v21 = vpop.permute.xlu1 %1164  ;;  %vm3007_vm0 = vmmov %vm3005_vm4 }
 0xdeb   : > { %v1169_v23 = vsel %vm3000_vm14, %v1168_v18, %v1165_v21  ;;  %1176 = vrot.lane.b32.xlu1 %v1165_v21, %s2377_s16  ;;  %vm3004_vm14 = vmmov %vm3002_vm6 }
 0xdec   : > { %v2314_v24 = vpack.i.bf16 %v1169_v23, %v1167_v22 }
 0xdee   : > { %2315 = vrot.lane.b32.xlu0 %v2314_v24, %s2377_s16 }
 0xe5d   : > { %v1177_v30 = vpop.permute.xlu1 %1176 }
 0xe60   : > { %v2316_v25 = vpop.permute.xlu0 %2315 }
 0xe61   : > { %v2318_v27 = vunpack.i.h.bf16 %v2316_v25  ;;  %v2317_v28 = vunpack.i.l.bf16 %v2316_v25 }
 0xe63   : > { %v2249_v29 = vpack.c.bf16 %v2318_v27, %v2317_v28 }
 0xe65   : > { %2251 = vmatpush3.bf16.xpose.msk.msra.mxu1 %vm3001_vm3, %v2249_v29 }
 0xe66   : > { %2091 = vmatprep.subr.mxu1 %v2373_v61 }
 0xe6d   : > { %2092 = vmatpush3.xpose.msk.msra.mxu1 %vm3002_vm6, %v1177_v30 }
 0xe6e   : > { %2261 = vmatprep.subr.bf16.mxu1 %v2371_v3 }
 0xe70   : > { %2094 = vmatmul.mubr.msk.f32.vlgmr.msra.gmra.mrb[20].mxu1 %vm3003_vm8, %v1167_v22 }
 0xe71   : > { %2096 = vmatprep.mubr.msk.f32.mxu1 %vm2989_vm12, %v2373_v61 }
 0xe74   : > { %2097 = vmatmul.mubr.msk.f32.gmra.mrb[22].mxu1 %vm3004_vm14, %v1169_v23 }
 0xe75   : > { %2099 = vmatprep.mubr.msk.f32.mxu1 %vm2989_vm12, %v2373_v61 }
 0xe78   : > { %2100 = vmatmul.mubr.msk.f32.gmra.mrb[24].mxu1 %vm3005_vm4, %v1165_v21 }
 0xe79   : > { %2136 = vmatprep.mubr.msk.f32.mxu1 %vm2989_vm12, %v2373_v61 }
 0xf43   : > { %v1256_v26 = vpop.f32.mrb[20].mxu1 }
 0xf44   : > { %v1270_v31 = vmul.f32 0.35355338, %v1256_v26  ;;  %v2095_v32 = vpop.f32.mrb[21].mxu1 }
 0xf46   : > { %v1273_v35 = vsel %vm322_vm5, %v1270_v31, -1e+30  ;;  %vm3008_vm5 = vcmask 195584  }
 0xf47   : > { %v1261_v36 = vpop.f32.mrb[22].mxu1  ;;  %v1276_v37 = vsel %vm601_vm1, %v1273_v35, -inf }
 0xf48   : > { %v1271_v38 = vmul.f32 0.35355338, %v1261_v36  ;;  %1277 = vmax.xlane.f32.xlu0 %v1276_v37  ;;  %v2098_v39 = vpop.f32.mrb[23].mxu1 }
 0xf4a   : > { %v1274_v40 = vsel %vm2620_vm7, %v1271_v38, -1e+30  ;;  %vm3010_vm7 = vcmask 258048  }
 0xf4b   : > { %v1266_v41 = vpop.f32.mrb[24].mxu1  ;;  %v1279_v42 = vsel %vm601_vm1, %v1274_v40, -inf }
 0xf4c   : > { %v1272_v43 = vmul.f32 0.35355338, %v1266_v41  ;;  %1280 = vmax.xlane.f32.xlu1 %v1279_v42  ;;  %v2101_v45 = vpop.f32.mrb[25].mxu1 }
 0xf4e   : > { %v1275_v33 = vsel %vm2629_vm11, %v1272_v43, -1e+30  ;;  %vm3011_vm11 = vmmov %vm3010_vm7 }
 0xf4f   : > { %v1282_v34 = vsel %vm608_vm10, %v1275_v33, -inf }
 0xf50   : > { %1283 = vmax.xlane.f32.xlu0 %v1282_v34 }
 0xfd5   : > { %v1278_v46 = vpop.xlane.xlu0 %1277 }
 0xfd6   : > { %v1285_v47 = vsub.f32 %v1273_v35, %v1278_v46 }
 0xfd8   : > { %v1288_v48 = vmul.f32 1.442695, %v1285_v47 }
 0xfd9   : > { %v1281_v50 = vpop.xlane.xlu1 %1280 }
 0xfda   : > { %2345 = vpow2.f32 %v1288_v48  ;;  %v1286_v53 = vsub.f32 %v1274_v40, %v1281_v50  ;;  %v1905_v40 = vld [vmem:[%s2959_s2 + $0x12] ss:$0 sm:$0xff] }
 0xfdc   : > { %v1290_v44 = vmul.f32 1.442695, %v1286_v53  ;;  %v1538_v53 = vld [vmem:[%s2958_s1 + $0x1a0] sm:$0xff] }
 0xfdd   : > { %v1284_v54 = vpop.xlane.xlu0 %1283 }
 0xfde   : > { %2347 = vpow2.f32 %v1290_v44  ;;  %v1287_v55 = vsub.f32 %v1275_v33, %v1284_v54  ;;  %v1540_v54 = vld [vmem:[%s2958_s1 + $0x1b0] sm:$0xff] }
 0xfe0   : > { %v1292_v56 = vmul.f32 1.442695, %v1287_v55  ;;  %v1541_v55 = vld [vmem:[%s2958_s1 + $0x1b8] sm:$0xff] }
 0xfe2   : > { %2349 = vpow2.f32 %v1292_v56  ;;  %v2265_v56 = vpack.c.bf16 %v1541_v55, %v1540_v54 }
 0xfe4   : > { %v2346_v57 = vpop.eup %2345 }
 0xfe5   : > { %v1294_v59 = vsel %vm601_vm1, %v2346_v57, 0.0 }
 0xfe6   : > { %1295 = vadd.xlane.f32.xlu0 %v1294_v59 }
 0xfe8   : > { %v2348_v51 = vpop.eup %2347 }
 0xfe9   : > { %v1297_v60 = vsel %vm601_vm1, %v2348_v51, 0.0 }
 0xfea   : > { %1298 = vadd.xlane.f32.xlu1 %v1297_v60 }
 0xfec   : > { %v2350_v58 = vpop.eup %2349 }
 0xfed   : > { %v1300_v62 = vsel %vm608_vm10, %v2350_v58, 0.0 }
 0xfee   : > { %1301 = vadd.xlane.f32.xlu0 %v1300_v62 }
 0xffb   : > { %2320 = vrot.lane.b32.xlu1 %v2314_v24, %s2378_s17 }
0x1004   : > { %1313 = vrot.lane.b32.xlu0 %v1165_v21, %s2378_s17 }
0x1073   : > { %v1296_v63 = vpop.xlane.xlu0 %1295 }
0x1074   : > { %2351 = vrcp.f32 %v1296_v63  ;;  %v1908_v63 = vld [vmem:[%s2959_s2 + $0x14] ss:$0 sm:$0xff] }
0x1077   : > { %v1299_v0 = vpop.xlane.xlu1 %1298 }
0x1078   : > { %2353 = vrcp.f32 %v1299_v0 }
0x107b   : > { %v2321_v1 = vpop.permute.xlu1 %2320  ;;  %v1302_v2 = vpop.xlane.xlu0 %1301 }
0x107c   : > { %v2323_v49 = vunpack.i.h.bf16 %v2321_v1  ;;  %v2322_v4 = vunpack.i.l.bf16 %v2321_v1  ;;  %2355 = vrcp.f32 %v1302_v2  ;;  %v1629_v2 = vld [vmem:[%s2958_s1 + $0x1c0] sm:$0xff] }
0x107e   : > { %v2253_v5 = vpack.c.bf16 %v2323_v49, %v2322_v4  ;;  %v2352_v6 = vpop.eup %2351  ;;  %v1630_v49 = vld [vmem:[%s2958_s1 + $0x1c8] sm:$0xff] }
0x107f   : > { %v1304_v7 = vmul.f32 %v2352_v6, %v2346_v57  ;;  %v1314_v8 = vpop.permute.xlu0 %1313  ;;  %v2268_v4 = vpack.c.bf16 %v1630_v49, %v1629_v2 }
0x1080   : > { %2254 = vmatpush3.bf16.msra.mxu0 %v2253_v5  ;;  %v1631_v5 = vld [vmem:[%s2958_s1 + $0x1d0] sm:$0xff] }
0x1081   : > { %2106 = vmatprep.subr.mxu0 %v2373_v61 }
0x1082   : > { %v2354_v9 = vpop.eup %2353 }
0x1083   : > { %v1306_v10 = vmul.f32 %v2354_v9, %v2348_v51 }
0x1084   : > { %2107 = vmatpush3.msk.msra.mxu0 %vm653_vm2, %v1314_v8  ;;  %v1634_v8 = vld [vmem:[%s2958_s1 + $0x1e8] sm:$0xff]  ;;  %vm3013_vm2 = vcmask 523264  }
0x1085   : > { %2109 = vmatmul.mubr.msk.f32.vlgmr.msra.gmra.mrb[4].mxu0 %vm601_vm1, %v1304_v7  ;;  %2255 = vmatprep.subr.bf16.mxu0 %v2371_v3  ;;  %v1633_v7 = vld [vmem:[%s2958_s1 + $0x1e0] sm:$0xff] }
0x1086   : > { %2111 = vmatprep.mubr.msk.f32.mxu0 %vm2989_vm12, %v2373_v61  ;;  %v2356_v11 = vpop.eup %2355  ;;  %2257 = vmatpush3.bf16.msra.mxu0 %v2256_v15  ;;  %v2274_v9 = vpack.c.bf16 %v1634_v8, %v1633_v7 }
0x1087   : > { %v1308_v12 = vmul.f32 %v2356_v11, %v2350_v58  ;;  %2258 = vmatprep.subr.bf16.mxu0 %v2371_v3  ;;  %v1907_v58 = vld [vmem:[%s2959_s2 + $0x13] ss:$0 sm:$0xff]  ;;  %v1636_v11 = vld [vmem:[%s2958_s1 + $0x1f8] sm:$0xff] }
0x1089   : > { %2112 = vmatmul.mubr.msk.f32.gmra.mrb[6].mxu0 %vm601_vm1, %v1306_v10  ;;  %v1635_v10 = vld [vmem:[%s2958_s1 + $0x1f0] sm:$0xff] }
0x108a   : > { %2114 = vmatprep.mubr.msk.f32.mxu0 %vm2989_vm12, %v2373_v61  ;;  %2260 = vmatpush3.bf16.msra.mxu0 %v2259_v19 }
0x108b   : > { %2267 = vmatprep.subr.bf16.mxu0 %v2371_v3 }
0x108d   : > { %2115 = vmatmul.mubr.msk.f32.gmra.mrb[8].mxu0 %vm601_vm1, %v1308_v12  ;;  %vm3009_vm1 = vcmask 261120   ;;  %v2277_v12 = vpack.c.bf16 %v1636_v11, %v1635_v10 }
0x108e   : > { %2125 = vmatprep.mubr.msk.f32.mxu0 %vm2989_vm12, %v2373_v61  ;;  %vm3012_vm10 = vmmov %vm3009_vm1 }
0x1158   : > { %v1394_v20 = vpop.f32.mrb[4].mxu0 }
0x1159   : > { %v2110_v18 = vpop.f32.mrb[5].mxu0  ;;  %v1410_v22 = vrot.slane %v1394_v20, 5 }
0x115c   : > { %v1399_v21 = vpop.f32.mrb[6].mxu0 }
0x115d   : > { %v1411_v23 = vrot.slane %v1399_v21, 5  ;;  %v2113_v24 = vpop.f32.mrb[7].mxu0  ;;  %v1421_v28 = vrot.slane %v1399_v21, 7  ;;  %v1416_v26 = vrot.slane %v1399_v21, 2 }
0x115f   : > { %v1412_v25 = vsel %vm738_vm13, %v1410_v22, %v1411_v23  ;;  %vm3014_vm13 = vmmov %vm3009_vm1 }
0x1160   : > { %1413 = vrot.lane.b32.xlu1 %v1412_v25, %s2379_s26  ;;  %v1404_v27 = vpop.f32.mrb[8].mxu0  ;;  %s166_s26 = scalar_lea.vmem %s2960_s3, %s3016_s13 }
0x1161   : > { %v1422_v29 = vrot.slane %v1404_v27, 7  ;;  %v2116_v30 = vpop.f32.mrb[9].mxu0  ;;  %v1911_v27 = vld [vmem:[%s2959_s2 + $0x16] ss:$0 sm:$0xff] }
0x1163   : > { %v1423_v31 = vsel %vm3006_vm9, %v1421_v28, %v1422_v29 }
0x1164   : > { %1417 = vrot.lane.b32.xlu1 %v1416_v26, %s2380_s27  ;;  %1424 = vrot.lane.b32.xlu0 %v1423_v31, %s2381_s28 }
0x11d2   : > { %v1414_v32 = vpop.permute.xlu1 %1413 }
0x11d3   : > { %v1427_v35 = vsel %vm3007_vm0, %v1394_v20, %v1414_v32 }
0x11d6   : > { %v1418_v36 = vpop.permute.xlu1 %1417  ;;  %v1425_v37 = vpop.permute.xlu0 %1424 }
0x11d7   : > { %v1428_v38 = vsel %vm757_vm15, %v1427_v35, %v1418_v36 }
0x11d8   : > { %v1429_v39 = vsel %vm3008_vm5, %v1428_v38, %v1425_v37 }
0x11d9   : > { %2126 = vmatmul.mubr.msk.f32.vlgmr.msra.gmra.mrb[10].mxu0 %vm3009_vm1, %v1429_v39  ;;  %v1734_v39 = vld [vmem:[%s2958_s1 + $0x200] sm:$0xff] }
0x11da   : > { %2155 = vmatprep.mubr.msk.f32.mxu0 %vm2989_vm12, %v2373_v61  ;;  %2269 = vmatpush3.bf16.msra.mxu0 %v2268_v4 }
0x11db   : > { %2270 = vmatprep.subr.bf16.mxu0 %v2371_v3 }
0x12ac   : > { %v1508_v41 = vpop.f32.mrb[10].mxu0 }
0x12ad   : > { %v1509_v42 = vadd.f32 %v1905_v40, %v1508_v41  ;;  %v2127_v43 = vpop.f32.mrb[11].mxu0  ;;  %v1735_v40 = vld [vmem:[%s2958_s1 + $0x208] sm:$0xff] }
0x12ae   : > { %v2280_v41 = vpack.c.bf16 %v1735_v40, %v1734_v39  ;;  %v1737_v43 = vld [vmem:[%s2958_s1 + $0x218] sm:$0xff] }
0x12af   : > { %v2863_v45 = vadd.f32 %v1509_v42, %v2751_v52  ;;  %v1539_v52 = vld [vmem:[%s2958_s1 + $0x1a8] sm:$0xff]  ;;  %v1736_v42 = vld [vmem:[%s2958_s1 + $0x210] sm:$0xff] }
0x12b0   : > { %v2262_v44 = vpack.c.bf16 %v1539_v52, %v1538_v53 }
0x12b1   : > { %v1515_v33 = vsel %vm3010_vm7, %v2863_v45, 0.0 }
0x12b2   : > { %1516 = vadd.xlane.f32.xlu1 %v1515_v33  ;;  %2263 = vmatpush3.bf16.msra.mxu1 %v2262_v44  ;;  %v1738_v44 = vld [vmem:[%s2959_s2 + $0x19] sm:$0x1] }
0x12b3   : > { %2264 = vmatprep.subr.bf16.mxu1 %v2371_v3 }
0x12b6   : > { %2266 = vmatpush3.bf16.msra.mxu1 %v2265_v56 }
0x12b7   : > { %2279 = vmatprep.subr.bf16.mxu1 %v2371_v3 }
0x133f   : > { %v1517_v34 = vpop.xlane.xlu1 %1516 }
0x1340   : > { %v1518_v46 = vmul.f32 0.03125, %v1517_v34 }
0x1342   : > { %v1519_v47 = vsub.f32 %v2863_v45, %v1518_v46 }
0x1344   : > { %v1520_v48 = vmul.f32 %v1519_v47, %v1519_v47 }
0x1346   : > { %v1521_v50 = vsel %vm3011_vm11, %v1520_v48, 0.0 }
0x1347   : > { %1522 = vadd.xlane.f32.xlu0 %v1521_v50  ;;  %v1717_v50 = vld [vmem:[%s2959_s2 + $0x18] sm:$0x1] }
0x13d4   : > { %v1523_v57 = vpop.xlane.xlu0 %1522 }
0x13d5   : > { %v1524_v59 = vmul.f32 0.03125, %v1523_v57 }
0x13d7   : > { %v1525_v51 = vadd.f32 1e-12, %v1524_v59 }
0x13d9   : > { %2357 = vrsqrt.f32 %v1525_v51 }
0x13e3   : > { %v2358_v60 = vpop.eup %2357 }
0x13e4   : > { %v1527_v62 = vmul.f32 %v2358_v60, %v1519_v47 }
0x13e6   : > { %v1532_v0 = vmul.f32 %v1907_v58, %v1527_v62 }
0x13e8   : > { %v1537_v1 = vadd.f32 %v1908_v63, %v1532_v0 }
0x13ea   : > { %2137 = vmatmul.mubr.msk.f32.vlgmr.msra.gmra.mrb[26].mxu1 %vm3012_vm10, %v1537_v1 }
0x13eb   : > { %2166 = vmatprep.mubr.msk.f32.mxu1 %vm2989_vm12, %v2373_v61  ;;  %v1632_v61 = vld [vmem:[%s2958_s1 + $0x1d8] sm:$0xff]  ;;  %vm1718_vm12 = vcmask 253952   ;;  %2281 = vmatpush3.bf16.msra.mxu1 %v2280_v41 }
0x13ec   : > { %v2271_v6 = vpack.c.bf16 %v1632_v61, %v1631_v5  ;;  %2282 = vmatprep.subr.bf16.mxu1 %v2371_v3 }
0x13ee   : > { %2272 = vmatpush3.bf16.msra.mxu0 %v2271_v6 }
0x13ef   : > { %2273 = vmatprep.subr.bf16.mxu0 %v2371_v3 }
0x13f2   : > { %2275 = vmatpush3.bf16.msra.mxu0 %v2274_v9 }
0x13f3   : > { %2276 = vmatprep.subr.bf16.mxu0 %v2371_v3  ;;  %v1716_v3 = vld [vmem:[%s2959_s2 + $0x17] sm:$0x1] }
0x13f6   : > { %2278 = vmatpush3.bf16.msra.mxu0 %v2277_v12 }
0x14bd   : > { %v1616_v14 = vpop.f32.mrb[26].mxu1 }
0x14be   : > { %v1617_v15 = vadd.f32 %v1909_v13, %v1616_v14  ;;  %v2138_v16 = vpop.f32.mrb[27].mxu1 }
0x14c0   : > { %v1620_v17 = vmul.f32 %v1617_v15, %v1617_v15 }
0x14c2   : > { %v1621_v19 = vmul.f32 %v1620_v17, %v1617_v15 }
0x14c4   : > { %v1622_v20 = vmul.f32 0.044715, %v1621_v19 }
0x14c6   : > { %v1623_v18 = vadd.f32 %v1622_v20, %v1617_v15 }
0x14c8   : > { %v1624_v21 = vmul.f32 0.7978846, %v1623_v18 }
0x14ca   : > { %2359 = vtanh.f32 %v1624_v21 }
0x14d4   : > { %v2360_v22 = vpop.eup %2359 }
0x14d5   : > { %v1626_v23 = vadd.f32 1.0, %v2360_v22 }
0x14d7   : > { %v1627_v24 = vmul.f32 0.5, %v1626_v23 }
0x14d9   : > { %v1628_v25 = vmul.f32 %v1627_v24, %v1617_v15 }
0x14db   : > { %2156 = vmatmul.mubr.msk.f32.vlgmr.msra.gmra.mrb[12].mxu0 %vm3013_vm2, %v1628_v25 }
0x15ae   : > { %v1711_v28 = vpop.f32.mrb[12].mxu0 }
0x15af   : > { %v1712_v29 = vadd.f32 %v1911_v27, %v1711_v28  ;;  %v2157_v30 = vpop.f32.mrb[13].mxu0 }
0x15b1   : > { %v1715_v26 = vadd.f32 %v1712_v29, %v2863_v45  ;;  %v2283_v45 = vpack.c.bf16 %v1737_v43, %v1736_v42 }
0x15b3   : > { %v1719_v31 = vsel %vm1718_vm12, %v1715_v26, 0.0  ;;  %2284 = vmatpush3.bf16.msra.mxu1 %v2283_v45 }
0x15b4   : > { %1720 = vadd.xlane.f32.xlu0 %v1719_v31 }
0x1641   : > { %v1721_v32 = vpop.xlane.xlu0 %1720 }
0x1642   : > { %v1722_v35 = vmul.f32 0.03125, %v1721_v32 }
0x1644   : > { %v1723_v36 = vsub.f32 %v1715_v26, %v1722_v35 }
0x1646   : > { %v1724_v37 = vmul.f32 %v1723_v36, %v1723_v36 }
0x1648   : > { %v1725_v38 = vsel %vm1718_vm12, %v1724_v37, 0.0 }
0x1649   : > { %1726 = vadd.xlane.f32.xlu1 %v1725_v38 }
0x16d6   : > { %v1727_v33 = vpop.xlane.xlu1 %1726 }
0x16d7   : > { %v1728_v34 = vmul.f32 0.03125, %v1727_v33 }
0x16d9   : > { %v1729_v46 = vadd.f32 1e-12, %v1728_v34 }
0x16db   : > { %2361 = vrsqrt.f32 %v1729_v46 }
0x16e5   : > { %v2362_v47 = vpop.eup %2361 }
0x16e6   : > { %v1731_v48 = vmul.f32 %v2362_v47, %v1723_v36 }
0x16e8   : > { %v1732_v53 = vmul.f32 %v1731_v48, %v1716_v3 }
0x16ea   : > { %v1733_v52 = vadd.f32 %v1732_v53, %v1717_v50 }
0x16ec   : > { %2167 = vmatmul.mubr.msk.f32.vlgmr.msra.gmra.mrb[28].mxu1 %vm3014_vm13, %v1733_v52 }
0x17bf   : > { %v1808_v54 = vpop.f32.mrb[28].mxu1 }
0x17c0   : > { %v1809_v55 = vadd.f32 %v1808_v54, %v1738_v44  ;;  %v2168_v56 = vpop.f32.mrb[29].mxu1 }
0x17c2   : > { %1812 = vst [vmem:[%s166_s26] sm:$0x1] %v1809_v55 }
0x17c3 PF: > { %s13_s12 = sadd.s32 1, %s2369_s12  }
0x17c4   : > { %p10_p4 = scmp.ge.s32.totalorder %s13_s12, 4  }
0x17c6   :  { %12 = sbr.rel (!%p10_p4) target bundleno = 1 (0x1), region = 62 }

</bundles_post_ra>
